<compile_context>
chip_gen: v5e
topology: v5e:2x2
jax: 0.10.0
libtpu: 0.0.40
codegen_flags: <defaults>
</compile_context>

<pallas_src>
import math
import functools

import jax
import jax.numpy as jnp
from jax import lax
from jax.experimental import pallas as pl
from jax.experimental.pallas import tpu as pltpu


# --------------------------------------------------------------------------- #
# Fused decoder-stack kernel: grid=(B, num_layers); one step == one layer for
# one batch row.  Activations inside the kernel are (L, H).
# --------------------------------------------------------------------------- #
def _decoder_stack_kernel(
    # activations (per-batch (L, H) blocks of the flattened (B*L, H) arrays)
    tgt_ref, enc_ref,
    # per-layer weight matrices (bf16), layer axis indexed by the grid
    wqkv1_ref, wo1_ref, wqkv3_ref, wo3_ref, w1_ref, w2_ref,
    # packed small per-layer vectors (f32)
    vecH_ref,   # (1, 9, H):     bo1, g1, be1, bo3, g3, be3, b2, g2, be2
    vecI_ref,   # (1, 1, inner): b1
    # output (doubles as the VMEM-resident inter-layer carry)
    out_ref,
    # scratch: head-major staging buffers + merged attention output
    qh_s, kh_s, vh_s, o_s,
    *, H, num_heads, eps):

  layer = pl.program_id(1)
  nh = num_heads
  hd = H // nh
  scale = 1.0 / math.sqrt(hd)
  f32 = jnp.float32
  bf16 = jnp.bfloat16

  # Layer 0 consumes the target; later layers consume the previous layer's
  # output, which stays resident in out_ref (constant block index over layers).
  @pl.when(layer == 0)
  def _():
    out_ref[...] = tgt_ref[...]

  x = out_ref[...].astype(f32)        # (L, H)
  enc = enc_ref[...].astype(f32)      # (L, H)

  # packed per-layer vectors
  pvec = vecH_ref[0]                  # (9, H) f32
  bo1, g1, be1 = pvec[0:1], pvec[1:2], pvec[2:3]
  bo3, g3, be3 = pvec[3:4], pvec[4:5], pvec[5:6]
  b2,  g2, be2 = pvec[6:7], pvec[7:8], pvec[8:9]
  b1 = vecI_ref[0]                    # (1, inner) f32

  def layer_norm(z, g, b):
    # torch-module semantics: unbiased std (n-1), eps added to std (not var).
    mean = jnp.mean(z, axis=-1, keepdims=True)
    d = z - mean
    var = jnp.sum(d * d, axis=-1, keepdims=True) * (1.0 / (H - 1))
    inv = pl.reciprocal(jnp.sqrt(var) + eps, approx=False)   # exact, for parity
    return d * (g * inv) + b

  def split_heads(mat, dst_ref):
    # (L, H) f32 value -> (nh, L, hd) bf16 scratch via static slice stores.
    m16 = mat.astype(bf16)
    for h in range(nh):
      dst_ref[h, :, :] = m16[:, h * hd:(h + 1) * hd]

  def attention(q2, k2, v2):
    # q2/k2/v2: (L, H) f32.  Heads batched through a leading batch dimension.
    split_heads(q2, qh_s)
    split_heads(k2, kh_s)
    split_heads(v2, vh_s)
    q3 = qh_s[...]                    # (nh, L, hd) bf16
    k3 = kh_s[...]
    v3 = vh_s[...]
    s = jnp.einsum('hqd,hkd->hqk', q3, k3,
                   preferred_element_type=f32) * scale        # (nh, L, L) f32
    m = jnp.max(s, axis=-1, keepdims=True)
    p = jnp.exp(s - m)
    p = p * pl.reciprocal(jnp.sum(p, axis=-1, keepdims=True), approx=True)
    o3 = jnp.einsum('hqk,hkd->hqd', p.astype(bf16), v3,
                    preferred_element_type=f32)                # (nh, L, hd) f32
    # merge heads into a lane-contiguous (L, H) scratch (no concatenates)
    for h in range(nh):
      o_s[:, h * hd:(h + 1) * hd] = o3[h]
    return o_s[...]

  def mha(kq, vin, wqkv_ref, wo_ref, bo, same_inputs):
    # slp MultiheadAttention: queries default to keys (kq); values = vin.
    kq16 = kq.astype(bf16)
    if same_inputs:
      # one wide (L, H) x (H, 3H) projection matmul
      qkv = jnp.dot(kq16, wqkv_ref[0], preferred_element_type=f32)
      q2, k2, v2 = qkv[:, 0:H], qkv[:, H:2 * H], qkv[:, 2 * H:3 * H]
    else:
      qk = jnp.dot(kq16, wqkv_ref[0, :, 0:2 * H], preferred_element_type=f32)
      q2, k2 = qk[:, 0:H], qk[:, H:2 * H]
      v2 = jnp.dot(vin.astype(bf16), wqkv_ref[0, :, 2 * H:3 * H],
                   preferred_element_type=f32)
    o = attention(q2, k2, v2)                                   # (L, H) f32
    return jnp.dot(o.astype(bf16), wo_ref[0],
                   preferred_element_type=f32) + bo

  # ---- Sublayer1: LN(x + SelfAttn(x)) ------------------------------------- #
  a1 = mha(x, x, wqkv1_ref, wo1_ref, bo1, True)
  out1 = layer_norm(x + a1, g1, be1)

  # ---- Sublayer3 ("fuse"): LN(enc + Attn(k=q=enc, v=out1)) ---------------- #
  a3 = mha(enc, out1, wqkv3_ref, wo3_ref, bo3, False)
  out3 = layer_norm(enc + a3, g3, be3)

  # ---- Sublayer2: LN(out3 + FF2(relu(FF1(out3)))) ------------------------- #
  hmid = jnp.dot(out3.astype(bf16), w1_ref[0], preferred_element_type=f32) + b1
  hmid = jnp.maximum(hmid, 0.0)
  ff = jnp.dot(hmid.astype(bf16), w2_ref[0], preferred_element_type=f32) + b2
  out2 = layer_norm(out3 + ff, g2, be2)

  out_ref[...] = out2.astype(out_ref.dtype)


# --------------------------------------------------------------------------- #
# Wrapper
# --------------------------------------------------------------------------- #
def decoder_forward(target, encoded, params, *, num_heads, eps=1e-6):
  """target/encoded: (B, L, H) f32.  params: dict of (num_layers, ...) f32 arrays."""
  B, L, H = target.shape
  assert H % num_heads == 0
  hd = H // num_heads
  num_layers = params["wqkv1"].shape[0]
  inner = params["w1"].shape[-1]
  bf16 = jnp.bfloat16

  # bf16 weights: half the per-layer weight DMA bytes, native MXU operand dtype.
  wqkv1 = params["wqkv1"].astype(bf16)
  wo1 = params["wo1"].astype(bf16)
  wqkv3 = params["wqkv3"].astype(bf16)
  wo3 = params["wo3"].astype(bf16)
  w1 = params["w1"].astype(bf16)
  w2 = params["w2"].astype(bf16)
  # pack the small per-layer vectors: one (9, H) block + one (1, inner) block.
  vecH = jnp.concatenate(
      [params[k] for k in ("bo1", "g1", "be1", "bo3", "g3", "be3",
                           "b2", "g2", "be2")], axis=1)          # (NL, 9, H)
  vecI = params["b1"]                                            # (NL, 1, inner)

  act_spec = pl.BlockSpec((L, H), lambda b, l: (b, 0))

  def wspec(d0, d1):
    return pl.BlockSpec((1, d0, d1), lambda b, l: (l, 0, 0))

  kernel = functools.partial(
      _decoder_stack_kernel, H=H, num_heads=num_heads, eps=eps)

  out = pl.pallas_call(
      kernel,
      out_shape=jax.ShapeDtypeStruct((B * L, H), jnp.float32),
      grid=(B, num_layers),
      in_specs=[
          act_spec, act_spec,
          wspec(H, 3 * H), wspec(H, H),          # sublayer1 qkv / out proj
          wspec(H, 3 * H), wspec(H, H),          # sublayer3 qkv / out proj
          wspec(H, inner), wspec(inner, H),      # positionwise FF
          wspec(9, H), wspec(1, inner),          # packed small vectors
      ],
      out_specs=act_spec,
      scratch_shapes=[
          pltpu.VMEM((num_heads, L, hd), bf16),        # q heads
          pltpu.VMEM((num_heads, L, hd), bf16),        # k heads
          pltpu.VMEM((num_heads, L, hd), bf16),        # v heads
          pltpu.VMEM((L, H), jnp.float32),             # merged attn output
      ],
      compiler_params=pltpu.CompilerParams(
          dimension_semantics=("parallel", "arbitrary"),
          vmem_limit_bytes=48 * 1024 * 1024),
  )(target.reshape(B * L, H), encoded.reshape(B * L, H),
    wqkv1, wo1, wqkv3, wo3, w1, w2, vecH, vecI)
  return out.reshape(B, L, H)


# --------------------------------------------------------------------------- #
# Parameter init.  (The torch module deep-copies one layer -> identical init;
# we use distinct per-layer values to exercise the per-layer grid indexing,
# which is the general trained-weights case.)
# --------------------------------------------------------------------------- #
def init_decoder_params(key, num_layers, hidden, inner):
  def one_layer(k):
    ks = jax.random.split(k, 7)
    s = 1.0 / math.sqrt(hidden)
    wqkv1 = jax.random.normal(ks[0], (hidden, 3 * hidden), jnp.float32) * s
    wo1 = jax.random.normal(ks[1], (hidden, hidden), jnp.float32) * s
    wqkv3 = jax.random.normal(ks[2], (hidden, 3 * hidden), jnp.float32) * s
    wo3 = jax.random.normal(ks[3], (hidden, hidden), jnp.float32) * s
    w1 = jax.random.normal(ks[4], (hidden, inner), jnp.float32) * s
    w2 = jax.random.normal(ks[5], (inner, hidden), jnp.float32) / math.sqrt(inner)
    kb = jax.random.split(ks[6], 10)
    small = lambda kk, n: 0.1 * jax.random.normal(kk, (1, n), jnp.float32)
    return {
        "wqkv1": wqkv1, "wo1": wo1, "bo1": small(kb[0], hidden),
        "g1": 1.0 + small(kb[1], hidden), "be1": small(kb[2], hidden),
        "wqkv3": wqkv3, "wo3": wo3, "bo3": small(kb[3], hidden),
        "g3": 1.0 + small(kb[4], hidden), "be3": small(kb[5], hidden),
        "w1": w1, "b1": small(kb[6], inner),
        "w2": w2, "b2": small(kb[7], hidden),
        "g2": 1.0 + small(kb[8], hidden), "be2": small(kb[9], hidden),
    }

  layer_keys = jax.random.split(key, num_layers)
  layers = [one_layer(k) for k in layer_keys]
  return {k: jnp.stack([lyr[k] for lyr in layers], axis=0) for k in layers[0]}


# --------------------------------------------------------------------------- #
# Pure-JAX reference (same math incl. bf16 matmul operands / f32 accumulation)
# --------------------------------------------------------------------------- #
def _reference_decoder(target, encoded, params, *, num_heads, eps=1e-6):
  B, L, H = target.shape
  nh = num_heads
  hd = H // nh
  bf16 = jnp.bfloat16
  f32 = jnp.float32
  scale = 1.0 / math.sqrt(hd)

  def mm(a, b):   # bf16 operands, f32 accumulation (matches the kernel)
    return lax.dot_general(a.astype(bf16), b.astype(bf16),
                           (((a.ndim - 1,), (0,)), ((), ())),
                           preferred_element_type=f32)

  def ln(z, g, b):
    mean = jnp.mean(z, -1, keepdims=True)
    d = z - mean
    var = jnp.sum(d * d, -1, keepdims=True) / (H - 1)
    return g * d / (jnp.sqrt(var) + eps) + b

  def mha(kq, vin, wqkv, wo, bo):
    q = mm(kq, wqkv[:, :H])
    k = mm(kq, wqkv[:, H:2 * H])
    v = mm(vin, wqkv[:, 2 * H:])
    qh = q.reshape(B, L, nh, hd).transpose(0, 2, 1, 3).astype(bf16)
    kh = k.reshape(B, L, nh, hd).transpose(0, 2, 1, 3).astype(bf16)
    vh = v.reshape(B, L, nh, hd).transpose(0, 2, 1, 3).astype(bf16)
    s = jnp.einsum("bhqd,bhkd->bhqk", qh, kh,
                   preferred_element_type=f32) * scale
    p = jax.nn.softmax(s, axis=-1)
    o = jnp.einsum("bhqk,bhkd->bhqd", p.astype(bf16), vh,
                   preferred_element_type=f32)
    o = o.transpose(0, 2, 1, 3).reshape(B, L, H)
    return mm(o, wo) + bo

  x = target
  num_layers = params["wqkv1"].shape[0]
  for i in range(num_layers):
    p = {k: v[i] for k, v in params.items()}
    a1 = mha(x, x, p["wqkv1"], p["wo1"], p["bo1"])
    o1 = ln(x + a1, p["g1"], p["be1"])
    a3 = mha(encoded, o1, p["wqkv3"], p["wo3"], p["bo3"])
    o3 = ln(encoded + a3, p["g3"], p["be3"])
    h = jnp.maximum(mm(o3, p["w1"]) + p["b1"], 0.0)
    ff = mm(h, p["w2"]) + p["b2"]
    x = ln(o3 + ff, p["g2"], p["be2"])
  return x


# --------------------------------------------------------------------------- #
# Main
# --------------------------------------------------------------------------- #
if __name__ == "__main__":
  B, L, H = 2, 8, 32          # batch, seq (target == source length), hidden
  NUM_HEADS = 4
  INNER = 64
  NUM_LAYERS = 2

  key = jax.random.PRNGKey(0)
  k_tgt, k_enc, k_par = jax.random.split(key, 3)

  target = jax.random.normal(k_tgt, (B, L, H), jnp.float32)
  encoded = jax.random.normal(k_enc, (B, L, H), jnp.float32)
  params = init_decoder_params(k_par, NUM_LAYERS, H, INNER)

  out = decoder_forward(target, encoded, params, num_heads=NUM_HEADS)
  out = jax.block_until_ready(out)

  assert out.shape == (B, L, H)
  assert bool(jnp.all(jnp.isfinite(out)))

  ref = _reference_decoder(target, encoded, params, num_heads=NUM_HEADS)
  max_err = float(jnp.max(jnp.abs(out - ref)))
  # bf16 matmul operands + approx softmax reciprocal => relaxed tolerance.
  assert bool(jnp.allclose(out, ref, atol=2e-2, rtol=2e-2)), max_err

  print("KERNEL_OK")
</pallas_src>

<mosaic_0001>
module attributes {stable_mosaic.version = 11 : i64} {
  func.func @_decoder_stack_kernel(%arg0: i32, %arg1: i32, %arg2: memref<8x32xf32, #tpu.memory_space<vmem>>, %arg3: memref<8x32xf32, #tpu.memory_space<vmem>>, %arg4: memref<1x32x96xbf16, #tpu.memory_space<vmem>>, %arg5: memref<1x32x32xbf16, #tpu.memory_space<vmem>>, %arg6: memref<1x32x96xbf16, #tpu.memory_space<vmem>>, %arg7: memref<1x32x32xbf16, #tpu.memory_space<vmem>>, %arg8: memref<1x32x64xbf16, #tpu.memory_space<vmem>>, %arg9: memref<1x64x32xbf16, #tpu.memory_space<vmem>>, %arg10: memref<1x9x32xf32, #tpu.memory_space<vmem>>, %arg11: memref<1x1x64xf32, #tpu.memory_space<vmem>>, %arg12: memref<8x32xf32, #tpu.memory_space<vmem>>, %arg13: memref<4x8x8xbf16, #tpu.memory_space<vmem>>, %arg14: memref<4x8x8xbf16, #tpu.memory_space<vmem>>, %arg15: memref<4x8x8xbf16, #tpu.memory_space<vmem>>, %arg16: memref<8x32xf32, #tpu.memory_space<vmem>>) attributes {dimension_semantics = [#tpu.dimension_semantics<parallel>, #tpu.dimension_semantics<arbitrary>], iteration_bounds = array<i64: 2, 2>, scalar_prefetch = 0 : i64, scratch_operands = 4 : i64, tpu.core_type = #tpu.core_type<tc>, window_params = [{transform_indices = @transform_0, window_bounds = array<i64: 8, 32>}, {transform_indices = @transform_1, window_bounds = array<i64: 8, 32>}, {transform_indices = @transform_2, window_bounds = array<i64: 1, 32, 96>}, {transform_indices = @transform_3, window_bounds = array<i64: 1, 32, 32>}, {transform_indices = @transform_4, window_bounds = array<i64: 1, 32, 96>}, {transform_indices = @transform_5, window_bounds = array<i64: 1, 32, 32>}, {transform_indices = @transform_6, window_bounds = array<i64: 1, 32, 64>}, {transform_indices = @transform_7, window_bounds = array<i64: 1, 64, 32>}, {transform_indices = @transform_8, window_bounds = array<i64: 1, 9, 32>}, {transform_indices = @transform_9, window_bounds = array<i64: 1, 1, 64>}, {transform_indices = @transform_10, window_bounds = array<i64: 8, 32>}]} {
    %c0_i32 = arith.constant 0 : i32
    %0 = arith.cmpi eq, %arg1, %c0_i32 : i32
    %1 = arith.extui %0 : i1 to i32
    %c0_i32_0 = arith.constant 0 : i32
    %2 = arith.cmpi ne, %1, %c0_i32_0 : i32
    scf.if %2 {
      %c0_168 = arith.constant 0 : index
      %c0_169 = arith.constant 0 : index
      %292 = vector.load %arg2[%c0_168, %c0_169] : memref<8x32xf32, #tpu.memory_space<vmem>>, vector<8x32xf32>
      %c0_170 = arith.constant 0 : index
      %c0_171 = arith.constant 0 : index
      %293 = vector.load %arg12[%c0_170, %c0_171] : memref<8x32xf32, #tpu.memory_space<vmem>>, vector<8x32xf32>
      tpu.vector_store %arg12[%c0_170, %c0_171], %292 {strides = array<i32>} : memref<8x32xf32, #tpu.memory_space<vmem>>, vector<8x32xf32>,
    } else {
    }
    %c0 = arith.constant 0 : index
    %c0_1 = arith.constant 0 : index
    %3 = vector.load %arg12[%c0, %c0_1] : memref<8x32xf32, #tpu.memory_space<vmem>>, vector<8x32xf32>
    %c0_2 = arith.constant 0 : index
    %c0_3 = arith.constant 0 : index
    %4 = vector.load %arg3[%c0_2, %c0_3] : memref<8x32xf32, #tpu.memory_space<vmem>>, vector<8x32xf32>
    %c0_4 = arith.constant 0 : index
    %c0_5 = arith.constant 0 : index
    %c0_6 = arith.constant 0 : index
    %5 = vector.load %arg10[%c0_4, %c0_5, %c0_6] : memref<1x9x32xf32, #tpu.memory_space<vmem>>, vector<1x9x32xf32>
    %6 = vector.shape_cast %5 : vector<1x9x32xf32> to vector<9x32xf32>
    %7 = vector.extract_strided_slice %6 {offsets = [0, 0], sizes = [1, 32], strides = [1, 1]} : vector<9x32xf32> to vector<1x32xf32>
    %8 = vector.extract_strided_slice %6 {offsets = [1, 0], sizes = [1, 32], strides = [1, 1]} : vector<9x32xf32> to vector<1x32xf32>
    %9 = vector.extract_strided_slice %6 {offsets = [2, 0], sizes = [1, 32], strides = [1, 1]} : vector<9x32xf32> to vector<1x32xf32>
    %10 = vector.extract_strided_slice %6 {offsets = [3, 0], sizes = [1, 32], strides = [1, 1]} : vector<9x32xf32> to vector<1x32xf32>
    %11 = vector.extract_strided_slice %6 {offsets = [4, 0], sizes = [1, 32], strides = [1, 1]} : vector<9x32xf32> to vector<1x32xf32>
    %12 = vector.extract_strided_slice %6 {offsets = [5, 0], sizes = [1, 32], strides = [1, 1]} : vector<9x32xf32> to vector<1x32xf32>
    %13 = vector.extract_strided_slice %6 {offsets = [6, 0], sizes = [1, 32], strides = [1, 1]} : vector<9x32xf32> to vector<1x32xf32>
    %14 = vector.extract_strided_slice %6 {offsets = [7, 0], sizes = [1, 32], strides = [1, 1]} : vector<9x32xf32> to vector<1x32xf32>
    %15 = vector.extract_strided_slice %6 {offsets = [8, 0], sizes = [1, 32], strides = [1, 1]} : vector<9x32xf32> to vector<1x32xf32>
    %c0_7 = arith.constant 0 : index
    %c0_8 = arith.constant 0 : index
    %c0_9 = arith.constant 0 : index
    %16 = vector.load %arg11[%c0_7, %c0_8, %c0_9] : memref<1x1x64xf32, #tpu.memory_space<vmem>>, vector<1x1x64xf32>
    %17 = vector.shape_cast %16 : vector<1x1x64xf32> to vector<1x64xf32>
    %18 = arith.truncf %3 : vector<8x32xf32> to vector<8x32xbf16>
    %c0_10 = arith.constant 0 : index
    %c0_11 = arith.constant 0 : index
    %c0_12 = arith.constant 0 : index
    %19 = vector.load %arg4[%c0_10, %c0_11, %c0_12] : memref<1x32x96xbf16, #tpu.memory_space<vmem>>, vector<1x32x96xbf16>
    %20 = vector.shape_cast %19 : vector<1x32x96xbf16> to vector<32x96xbf16>
    %cst = arith.constant dense<0.000000e+00> : vector<8x96xf32>
    %21 = tpu.matmul %18, %20, %cst {dimension_numbers = #tpu.dot_dimension_numbers<[1], [0], [0], [1], [0, 0, 1, 1], [], []>} : vector<8x32xbf16>, vector<32x96xbf16>, vector<8x96xf32> -> vector<8x96xf32>
    %22 = vector.extract_strided_slice %21 {offsets = [0, 0], sizes = [8, 32], strides = [1, 1]} : vector<8x96xf32> to vector<8x32xf32>
    %23 = vector.extract_strided_slice %21 {offsets = [0, 32], sizes = [8, 32], strides = [1, 1]} : vector<8x96xf32> to vector<8x32xf32>
    %24 = vector.extract_strided_slice %21 {offsets = [0, 64], sizes = [8, 32], strides = [1, 1]} : vector<8x96xf32> to vector<8x32xf32>
    %25 = arith.truncf %22 : vector<8x32xf32> to vector<8x32xbf16>
    %26 = vector.extract_strided_slice %25 {offsets = [0, 0], sizes = [8, 8], strides = [1, 1]} : vector<8x32xbf16> to vector<8x8xbf16>
    %c0_13 = arith.constant 0 : index
    %c0_14 = arith.constant 0 : index
    %c0_15 = arith.constant 0 : index
    %27 = vector.load %arg13[%c0_13, %c0_14, %c0_15] : memref<4x8x8xbf16, #tpu.memory_space<vmem>>, vector<1x8x8xbf16>
    %28 = vector.shape_cast %27 : vector<1x8x8xbf16> to vector<8x8xbf16>
    %29 = vector.shape_cast %26 : vector<8x8xbf16> to vector<1x8x8xbf16>
    tpu.vector_store %arg13[%c0_13, %c0_14, %c0_15], %29 {strides = array<i32>} : memref<4x8x8xbf16, #tpu.memory_space<vmem>>, vector<1x8x8xbf16>,
    %30 = vector.extract_strided_slice %25 {offsets = [0, 8], sizes = [8, 8], strides = [1, 1]} : vector<8x32xbf16> to vector<8x8xbf16>
    %c1 = arith.constant 1 : index
    %c0_16 = arith.constant 0 : index
    %c0_17 = arith.constant 0 : index
    %31 = vector.load %arg13[%c1, %c0_16, %c0_17] : memref<4x8x8xbf16, #tpu.memory_space<vmem>>, vector<1x8x8xbf16>
    %32 = vector.shape_cast %31 : vector<1x8x8xbf16> to vector<8x8xbf16>
    %33 = vector.shape_cast %30 : vector<8x8xbf16> to vector<1x8x8xbf16>
    tpu.vector_store %arg13[%c1, %c0_16, %c0_17], %33 {strides = array<i32>} : memref<4x8x8xbf16, #tpu.memory_space<vmem>>, vector<1x8x8xbf16>,
    %34 = vector.extract_strided_slice %25 {offsets = [0, 16], sizes = [8, 8], strides = [1, 1]} : vector<8x32xbf16> to vector<8x8xbf16>
    %c2 = arith.constant 2 : index
    %c0_18 = arith.constant 0 : index
    %c0_19 = arith.constant 0 : index
    %35 = vector.load %arg13[%c2, %c0_18, %c0_19] : memref<4x8x8xbf16, #tpu.memory_space<vmem>>, vector<1x8x8xbf16>
    %36 = vector.shape_cast %35 : vector<1x8x8xbf16> to vector<8x8xbf16>
    %37 = vector.shape_cast %34 : vector<8x8xbf16> to vector<1x8x8xbf16>
    tpu.vector_store %arg13[%c2, %c0_18, %c0_19], %37 {strides = array<i32>} : memref<4x8x8xbf16, #tpu.memory_space<vmem>>, vector<1x8x8xbf16>,
    %38 = vector.extract_strided_slice %25 {offsets = [0, 24], sizes = [8, 8], strides = [1, 1]} : vector<8x32xbf16> to vector<8x8xbf16>
    %c3 = arith.constant 3 : index
    %c0_20 = arith.constant 0 : index
    %c0_21 = arith.constant 0 : index
    %39 = vector.load %arg13[%c3, %c0_20, %c0_21] : memref<4x8x8xbf16, #tpu.memory_space<vmem>>, vector<1x8x8xbf16>
    %40 = vector.shape_cast %39 : vector<1x8x8xbf16> to vector<8x8xbf16>
    %41 = vector.shape_cast %38 : vector<8x8xbf16> to vector<1x8x8xbf16>
    tpu.vector_store %arg13[%c3, %c0_20, %c0_21], %41 {strides = array<i32>} : memref<4x8x8xbf16, #tpu.memory_space<vmem>>, vector<1x8x8xbf16>,
    %42 = arith.truncf %23 : vector<8x32xf32> to vector<8x32xbf16>
    %43 = vector.extract_strided_slice %42 {offsets = [0, 0], sizes = [8, 8], strides = [1, 1]} : vector<8x32xbf16> to vector<8x8xbf16>
    %c0_22 = arith.constant 0 : index
    %c0_23 = arith.constant 0 : index
    %c0_24 = arith.constant 0 : index
    %44 = vector.load %arg14[%c0_22, %c0_23, %c0_24] : memref<4x8x8xbf16, #tpu.memory_space<vmem>>, vector<1x8x8xbf16>
    %45 = vector.shape_cast %44 : vector<1x8x8xbf16> to vector<8x8xbf16>
    %46 = vector.shape_cast %43 : vector<8x8xbf16> to vector<1x8x8xbf16>
    tpu.vector_store %arg14[%c0_22, %c0_23, %c0_24], %46 {strides = array<i32>} : memref<4x8x8xbf16, #tpu.memory_space<vmem>>, vector<1x8x8xbf16>,
    %47 = vector.extract_strided_slice %42 {offsets = [0, 8], sizes = [8, 8], strides = [1, 1]} : vector<8x32xbf16> to vector<8x8xbf16>
    %c1_25 = arith.constant 1 : index
    %c0_26 = arith.constant 0 : index
    %c0_27 = arith.constant 0 : index
    %48 = vector.load %arg14[%c1_25, %c0_26, %c0_27] : memref<4x8x8xbf16, #tpu.memory_space<vmem>>, vector<1x8x8xbf16>
    %49 = vector.shape_cast %48 : vector<1x8x8xbf16> to vector<8x8xbf16>
    %50 = vector.shape_cast %47 : vector<8x8xbf16> to vector<1x8x8xbf16>
    tpu.vector_store %arg14[%c1_25, %c0_26, %c0_27], %50 {strides = array<i32>} : memref<4x8x8xbf16, #tpu.memory_space<vmem>>, vector<1x8x8xbf16>,
    %51 = vector.extract_strided_slice %42 {offsets = [0, 16], sizes = [8, 8], strides = [1, 1]} : vector<8x32xbf16> to vector<8x8xbf16>
    %c2_28 = arith.constant 2 : index
    %c0_29 = arith.constant 0 : index
    %c0_30 = arith.constant 0 : index
    %52 = vector.load %arg14[%c2_28, %c0_29, %c0_30] : memref<4x8x8xbf16, #tpu.memory_space<vmem>>, vector<1x8x8xbf16>
    %53 = vector.shape_cast %52 : vector<1x8x8xbf16> to vector<8x8xbf16>
    %54 = vector.shape_cast %51 : vector<8x8xbf16> to vector<1x8x8xbf16>
    tpu.vector_store %arg14[%c2_28, %c0_29, %c0_30], %54 {strides = array<i32>} : memref<4x8x8xbf16, #tpu.memory_space<vmem>>, vector<1x8x8xbf16>,
    %55 = vector.extract_strided_slice %42 {offsets = [0, 24], sizes = [8, 8], strides = [1, 1]} : vector<8x32xbf16> to vector<8x8xbf16>
    %c3_31 = arith.constant 3 : index
    %c0_32 = arith.constant 0 : index
    %c0_33 = arith.constant 0 : index
    %56 = vector.load %arg14[%c3_31, %c0_32, %c0_33] : memref<4x8x8xbf16, #tpu.memory_space<vmem>>, vector<1x8x8xbf16>
    %57 = vector.shape_cast %56 : vector<1x8x8xbf16> to vector<8x8xbf16>
    %58 = vector.shape_cast %55 : vector<8x8xbf16> to vector<1x8x8xbf16>
    tpu.vector_store %arg14[%c3_31, %c0_32, %c0_33], %58 {strides = array<i32>} : memref<4x8x8xbf16, #tpu.memory_space<vmem>>, vector<1x8x8xbf16>,
    %59 = arith.truncf %24 : vector<8x32xf32> to vector<8x32xbf16>
    %60 = vector.extract_strided_slice %59 {offsets = [0, 0], sizes = [8, 8], strides = [1, 1]} : vector<8x32xbf16> to vector<8x8xbf16>
    %c0_34 = arith.constant 0 : index
    %c0_35 = arith.constant 0 : index
    %c0_36 = arith.constant 0 : index
    %61 = vector.load %arg15[%c0_34, %c0_35, %c0_36] : memref<4x8x8xbf16, #tpu.memory_space<vmem>>, vector<1x8x8xbf16>
    %62 = vector.shape_cast %61 : vector<1x8x8xbf16> to vector<8x8xbf16>
    %63 = vector.shape_cast %60 : vector<8x8xbf16> to vector<1x8x8xbf16>
    tpu.vector_store %arg15[%c0_34, %c0_35, %c0_36], %63 {strides = array<i32>} : memref<4x8x8xbf16, #tpu.memory_space<vmem>>, vector<1x8x8xbf16>,
    %64 = vector.extract_strided_slice %59 {offsets = [0, 8], sizes = [8, 8], strides = [1, 1]} : vector<8x32xbf16> to vector<8x8xbf16>
    %c1_37 = arith.constant 1 : index
    %c0_38 = arith.constant 0 : index
    %c0_39 = arith.constant 0 : index
    %65 = vector.load %arg15[%c1_37, %c0_38, %c0_39] : memref<4x8x8xbf16, #tpu.memory_space<vmem>>, vector<1x8x8xbf16>
    %66 = vector.shape_cast %65 : vector<1x8x8xbf16> to vector<8x8xbf16>
    %67 = vector.shape_cast %64 : vector<8x8xbf16> to vector<1x8x8xbf16>
    tpu.vector_store %arg15[%c1_37, %c0_38, %c0_39], %67 {strides = array<i32>} : memref<4x8x8xbf16, #tpu.memory_space<vmem>>, vector<1x8x8xbf16>,
    %68 = vector.extract_strided_slice %59 {offsets = [0, 16], sizes = [8, 8], strides = [1, 1]} : vector<8x32xbf16> to vector<8x8xbf16>
    %c2_40 = arith.constant 2 : index
    %c0_41 = arith.constant 0 : index
    %c0_42 = arith.constant 0 : index
    %69 = vector.load %arg15[%c2_40, %c0_41, %c0_42] : memref<4x8x8xbf16, #tpu.memory_space<vmem>>, vector<1x8x8xbf16>
    %70 = vector.shape_cast %69 : vector<1x8x8xbf16> to vector<8x8xbf16>
    %71 = vector.shape_cast %68 : vector<8x8xbf16> to vector<1x8x8xbf16>
    tpu.vector_store %arg15[%c2_40, %c0_41, %c0_42], %71 {strides = array<i32>} : memref<4x8x8xbf16, #tpu.memory_space<vmem>>, vector<1x8x8xbf16>,
    %72 = vector.extract_strided_slice %59 {offsets = [0, 24], sizes = [8, 8], strides = [1, 1]} : vector<8x32xbf16> to vector<8x8xbf16>
    %c3_43 = arith.constant 3 : index
    %c0_44 = arith.constant 0 : index
    %c0_45 = arith.constant 0 : index
    %73 = vector.load %arg15[%c3_43, %c0_44, %c0_45] : memref<4x8x8xbf16, #tpu.memory_space<vmem>>, vector<1x8x8xbf16>
    %74 = vector.shape_cast %73 : vector<1x8x8xbf16> to vector<8x8xbf16>
    %75 = vector.shape_cast %72 : vector<8x8xbf16> to vector<1x8x8xbf16>
    tpu.vector_store %arg15[%c3_43, %c0_44, %c0_45], %75 {strides = array<i32>} : memref<4x8x8xbf16, #tpu.memory_space<vmem>>, vector<1x8x8xbf16>,
    %c0_46 = arith.constant 0 : index
    %c0_47 = arith.constant 0 : index
    %c0_48 = arith.constant 0 : index
    %76 = vector.load %arg13[%c0_46, %c0_47, %c0_48] : memref<4x8x8xbf16, #tpu.memory_space<vmem>>, vector<4x8x8xbf16>
    %c0_49 = arith.constant 0 : index
    %c0_50 = arith.constant 0 : index
    %c0_51 = arith.constant 0 : index
    %77 = vector.load %arg14[%c0_49, %c0_50, %c0_51] : memref<4x8x8xbf16, #tpu.memory_space<vmem>>, vector<4x8x8xbf16>
    %c0_52 = arith.constant 0 : index
    %c0_53 = arith.constant 0 : index
    %c0_54 = arith.constant 0 : index
    %78 = vector.load %arg15[%c0_52, %c0_53, %c0_54] : memref<4x8x8xbf16, #tpu.memory_space<vmem>>, vector<4x8x8xbf16>
    "tpu.trace_start"() <{level = 10 : i32, message = "hqd,hkd->hqk"}> : () -> ()
    %cst_55 = arith.constant dense<0.000000e+00> : vector<4x8x8xf32>
    %79 = tpu.matmul %76, %77, %cst_55 {dimension_numbers = #tpu.dot_dimension_numbers<[2], [2], [1], [1], [0, 0, 0, 1, 1, 1], [0], [0]>} : vector<4x8x8xbf16>, vector<4x8x8xbf16>, vector<4x8x8xf32> -> vector<4x8x8xf32>
    "tpu.trace_stop"() : () -> ()
    %cst_56 = arith.constant 0.353553385 : f32
    %80 = vector.broadcast %cst_56 : f32 to vector<4x8x8xf32>
    %81 = arith.mulf %79, %80 : vector<4x8x8xf32>
    %cst_57 = arith.constant dense<0xFF800000> : vector<4x8xf32>
    %82 = vector.multi_reduction <maximumf>, %81, %cst_57 [2] : vector<4x8x8xf32> to vector<4x8xf32>
    %83 = vector.shape_cast %82 : vector<4x8xf32> to vector<4x8x1xf32>
    %84 = vector.broadcast %83 : vector<4x8x1xf32> to vector<4x8x8xf32>
    %85 = arith.subf %81, %84 : vector<4x8x8xf32>
    %86 = math.exp %85 : vector<4x8x8xf32>
    %cst_58 = arith.constant dense<0.000000e+00> : vector<4x8xf32>
    %87 = vector.multi_reduction <add>, %86, %cst_58 [2] : vector<4x8x8xf32> to vector<4x8xf32>
    %88 = vector.shape_cast %87 : vector<4x8xf32> to vector<4x8x1xf32>
    %89 = tpu.reciprocal %88 {approx = true} : vector<4x8x1xf32> -> vector<4x8x1xf32>
    %90 = vector.broadcast %89 : vector<4x8x1xf32> to vector<4x8x8xf32>
    %91 = arith.mulf %86, %90 : vector<4x8x8xf32>
    %92 = arith.truncf %91 : vector<4x8x8xf32> to vector<4x8x8xbf16>
    "tpu.trace_start"() <{level = 10 : i32, message = "hqk,hkd->hqd"}> : () -> ()
    %cst_59 = arith.constant dense<0.000000e+00> : vector<4x8x8xf32>
    %93 = tpu.matmul %92, %78, %cst_59 {dimension_numbers = #tpu.dot_dimension_numbers<[2], [1], [1], [2], [0, 0, 0, 1, 1, 2], [0], [0]>} : vector<4x8x8xbf16>, vector<4x8x8xbf16>, vector<4x8x8xf32> -> vector<4x8x8xf32>
    "tpu.trace_stop"() : () -> ()
    %94 = vector.extract_strided_slice %93 {offsets = [0, 0, 0], sizes = [1, 8, 8], strides = [1, 1, 1]} : vector<4x8x8xf32> to vector<1x8x8xf32>
    %95 = vector.shape_cast %94 : vector<1x8x8xf32> to vector<8x8xf32>
    %c0_60 = arith.constant 0 : index
    %c0_61 = arith.constant 0 : index
    %96 = vector.load %arg16[%c0_60, %c0_61] : memref<8x32xf32, #tpu.memory_space<vmem>>, vector<8x8xf32>
    tpu.vector_store %arg16[%c0_60, %c0_61], %95 {strides = array<i32>} : memref<8x32xf32, #tpu.memory_space<vmem>>, vector<8x8xf32>,
    %97 = vector.extract_strided_slice %93 {offsets = [1, 0, 0], sizes = [1, 8, 8], strides = [1, 1, 1]} : vector<4x8x8xf32> to vector<1x8x8xf32>
    %98 = vector.shape_cast %97 : vector<1x8x8xf32> to vector<8x8xf32>
    %c0_62 = arith.constant 0 : index
    %c8 = arith.constant 8 : index
    %99 = vector.load %arg16[%c0_62, %c8] : memref<8x32xf32, #tpu.memory_space<vmem>>, vector<8x8xf32>
    tpu.vector_store %arg16[%c0_62, %c8], %98 {strides = array<i32>} : memref<8x32xf32, #tpu.memory_space<vmem>>, vector<8x8xf32>,
    %100 = vector.extract_strided_slice %93 {offsets = [2, 0, 0], sizes = [1, 8, 8], strides = [1, 1, 1]} : vector<4x8x8xf32> to vector<1x8x8xf32>
    %101 = vector.shape_cast %100 : vector<1x8x8xf32> to vector<8x8xf32>
    %c0_63 = arith.constant 0 : index
    %c16 = arith.constant 16 : index
    %102 = vector.load %arg16[%c0_63, %c16] : memref<8x32xf32, #tpu.memory_space<vmem>>, vector<8x8xf32>
    tpu.vector_store %arg16[%c0_63, %c16], %101 {strides = array<i32>} : memref<8x32xf32, #tpu.memory_space<vmem>>, vector<8x8xf32>,
    %103 = vector.extract_strided_slice %93 {offsets = [3, 0, 0], sizes = [1, 8, 8], strides = [1, 1, 1]} : vector<4x8x8xf32> to vector<1x8x8xf32>
    %104 = vector.shape_cast %103 : vector<1x8x8xf32> to vector<8x8xf32>
    %c0_64 = arith.constant 0 : index
    %c24 = arith.constant 24 : index
    %105 = vector.load %arg16[%c0_64, %c24] : memref<8x32xf32, #tpu.memory_space<vmem>>, vector<8x8xf32>
    tpu.vector_store %arg16[%c0_64, %c24], %104 {strides = array<i32>} : memref<8x32xf32, #tpu.memory_space<vmem>>, vector<8x8xf32>,
    %c0_65 = arith.constant 0 : index
    %c0_66 = arith.constant 0 : index
    %106 = vector.load %arg16[%c0_65, %c0_66] : memref<8x32xf32, #tpu.memory_space<vmem>>, vector<8x32xf32>
    %107 = arith.truncf %106 : vector<8x32xf32> to vector<8x32xbf16>
    %c0_67 = arith.constant 0 : index
    %c0_68 = arith.constant 0 : index
    %c0_69 = arith.constant 0 : index
    %108 = vector.load %arg5[%c0_67, %c0_68, %c0_69] : memref<1x32x32xbf16, #tpu.memory_space<vmem>>, vector<1x32x32xbf16>
    %109 = vector.shape_cast %108 : vector<1x32x32xbf16> to vector<32x32xbf16>
    %cst_70 = arith.constant dense<0.000000e+00> : vector<8x32xf32>
    %110 = tpu.matmul %107, %109, %cst_70 {dimension_numbers = #tpu.dot_dimension_numbers<[1], [0], [0], [1], [0, 0, 1, 1], [], []>} : vector<8x32xbf16>, vector<32x32xbf16>, vector<8x32xf32> -> vector<8x32xf32>
    %111 = vector.broadcast %7 : vector<1x32xf32> to vector<8x32xf32>
    %112 = arith.addf %110, %111 : vector<8x32xf32>
    %113 = arith.addf %3, %112 : vector<8x32xf32>
    %cst_71 = arith.constant dense<0.000000e+00> : vector<8xf32>
    %114 = vector.multi_reduction <add>, %113, %cst_71 [1] : vector<8x32xf32> to vector<8xf32>
    %115 = vector.shape_cast %114 : vector<8xf32> to vector<8x1xf32>
    %cst_72 = arith.constant 3.200000e+01 : f32
    %116 = vector.broadcast %cst_72 : f32 to vector<8x1xf32>
    %117 = arith.divf %115, %116 : vector<8x1xf32>
    %118 = vector.broadcast %117 : vector<8x1xf32> to vector<8x32xf32>
    %119 = arith.subf %113, %118 : vector<8x32xf32>
    %120 = arith.mulf %119, %119 : vector<8x32xf32>
    %cst_73 = arith.constant dense<0.000000e+00> : vector<8xf32>
    %121 = vector.multi_reduction <add>, %120, %cst_73 [1] : vector<8x32xf32> to vector<8xf32>
    %122 = vector.shape_cast %121 : vector<8xf32> to vector<8x1xf32>
    %cst_74 = arith.constant 0.0322580636 : f32
    %123 = vector.broadcast %cst_74 : f32 to vector<8x1xf32>
    %124 = arith.mulf %122, %123 : vector<8x1xf32>
    %125 = math.sqrt %124 : vector<8x1xf32>
    %cst_75 = arith.constant 9.99999997E-7 : f32
    %126 = vector.broadcast %cst_75 : f32 to vector<8x1xf32>
    %127 = arith.addf %125, %126 : vector<8x1xf32>
    %128 = tpu.reciprocal %127 : vector<8x1xf32> -> vector<8x1xf32>
    %129 = vector.broadcast %8 : vector<1x32xf32> to vector<8x32xf32>
    %130 = vector.broadcast %128 : vector<8x1xf32> to vector<8x32xf32>
    %131 = arith.mulf %129, %130 : vector<8x32xf32>
    %132 = arith.mulf %119, %131 : vector<8x32xf32>
    %133 = vector.broadcast %9 : vector<1x32xf32> to vector<8x32xf32>
    %134 = arith.addf %132, %133 : vector<8x32xf32>
    %135 = arith.truncf %4 : vector<8x32xf32> to vector<8x32xbf16>
    %c0_76 = arith.constant 0 : index
    %c0_77 = arith.constant 0 : index
    %c0_78 = arith.constant 0 : index
    %136 = vector.load %arg6[%c0_76, %c0_77, %c0_78] : memref<1x32x96xbf16, #tpu.memory_space<vmem>>, vector<1x32x64xbf16>
    %137 = vector.shape_cast %136 : vector<1x32x64xbf16> to vector<32x64xbf16>
    %cst_79 = arith.constant dense<0.000000e+00> : vector<8x64xf32>
    %138 = tpu.matmul %135, %137, %cst_79 {dimension_numbers = #tpu.dot_dimension_numbers<[1], [0], [0], [1], [0, 0, 1, 1], [], []>} : vector<8x32xbf16>, vector<32x64xbf16>, vector<8x64xf32> -> vector<8x64xf32>
    %139 = vector.extract_strided_slice %138 {offsets = [0, 0], sizes = [8, 32], strides = [1, 1]} : vector<8x64xf32> to vector<8x32xf32>
    %140 = vector.extract_strided_slice %138 {offsets = [0, 32], sizes = [8, 32], strides = [1, 1]} : vector<8x64xf32> to vector<8x32xf32>
    %141 = arith.truncf %134 : vector<8x32xf32> to vector<8x32xbf16>
    %c0_80 = arith.constant 0 : index
    %c0_81 = arith.constant 0 : index
    %c64 = arith.constant 64 : index
    %142 = vector.load %arg6[%c0_80, %c0_81, %c64] : memref<1x32x96xbf16, #tpu.memory_space<vmem>>, vector<1x32x32xbf16>
    %143 = vector.shape_cast %142 : vector<1x32x32xbf16> to vector<32x32xbf16>
    %cst_82 = arith.constant dense<0.000000e+00> : vector<8x32xf32>
    %144 = tpu.matmul %141, %143, %cst_82 {dimension_numbers = #tpu.dot_dimension_numbers<[1], [0], [0], [1], [0, 0, 1, 1], [], []>} : vector<8x32xbf16>, vector<32x32xbf16>, vector<8x32xf32> -> vector<8x32xf32>
    %145 = arith.truncf %139 : vector<8x32xf32> to vector<8x32xbf16>
    %146 = vector.extract_strided_slice %145 {offsets = [0, 0], sizes = [8, 8], strides = [1, 1]} : vector<8x32xbf16> to vector<8x8xbf16>
    %c0_83 = arith.constant 0 : index
    %c0_84 = arith.constant 0 : index
    %c0_85 = arith.constant 0 : index
    %147 = vector.load %arg13[%c0_83, %c0_84, %c0_85] : memref<4x8x8xbf16, #tpu.memory_space<vmem>>, vector<1x8x8xbf16>
    %148 = vector.shape_cast %147 : vector<1x8x8xbf16> to vector<8x8xbf16>
    %149 = vector.shape_cast %146 : vector<8x8xbf16> to vector<1x8x8xbf16>
    tpu.vector_store %arg13[%c0_83, %c0_84, %c0_85], %149 {strides = array<i32>} : memref<4x8x8xbf16, #tpu.memory_space<vmem>>, vector<1x8x8xbf16>,
    %150 = vector.extract_strided_slice %145 {offsets = [0, 8], sizes = [8, 8], strides = [1, 1]} : vector<8x32xbf16> to vector<8x8xbf16>
    %c1_86 = arith.constant 1 : index
    %c0_87 = arith.constant 0 : index
    %c0_88 = arith.constant 0 : index
    %151 = vector.load %arg13[%c1_86, %c0_87, %c0_88] : memref<4x8x8xbf16, #tpu.memory_space<vmem>>, vector<1x8x8xbf16>
    %152 = vector.shape_cast %151 : vector<1x8x8xbf16> to vector<8x8xbf16>
    %153 = vector.shape_cast %150 : vector<8x8xbf16> to vector<1x8x8xbf16>
    tpu.vector_store %arg13[%c1_86, %c0_87, %c0_88], %153 {strides = array<i32>} : memref<4x8x8xbf16, #tpu.memory_space<vmem>>, vector<1x8x8xbf16>,
    %154 = vector.extract_strided_slice %145 {offsets = [0, 16], sizes = [8, 8], strides = [1, 1]} : vector<8x32xbf16> to vector<8x8xbf16>
    %c2_89 = arith.constant 2 : index
    %c0_90 = arith.constant 0 : index
    %c0_91 = arith.constant 0 : index
    %155 = vector.load %arg13[%c2_89, %c0_90, %c0_91] : memref<4x8x8xbf16, #tpu.memory_space<vmem>>, vector<1x8x8xbf16>
    %156 = vector.shape_cast %155 : vector<1x8x8xbf16> to vector<8x8xbf16>
    %157 = vector.shape_cast %154 : vector<8x8xbf16> to vector<1x8x8xbf16>
    tpu.vector_store %arg13[%c2_89, %c0_90, %c0_91], %157 {strides = array<i32>} : memref<4x8x8xbf16, #tpu.memory_space<vmem>>, vector<1x8x8xbf16>,
    %158 = vector.extract_strided_slice %145 {offsets = [0, 24], sizes = [8, 8], strides = [1, 1]} : vector<8x32xbf16> to vector<8x8xbf16>
    %c3_92 = arith.constant 3 : index
    %c0_93 = arith.constant 0 : index
    %c0_94 = arith.constant 0 : index
    %159 = vector.load %arg13[%c3_92, %c0_93, %c0_94] : memref<4x8x8xbf16, #tpu.memory_space<vmem>>, vector<1x8x8xbf16>
    %160 = vector.shape_cast %159 : vector<1x8x8xbf16> to vector<8x8xbf16>
    %161 = vector.shape_cast %158 : vector<8x8xbf16> to vector<1x8x8xbf16>
    tpu.vector_store %arg13[%c3_92, %c0_93, %c0_94], %161 {strides = array<i32>} : memref<4x8x8xbf16, #tpu.memory_space<vmem>>, vector<1x8x8xbf16>,
    %162 = arith.truncf %140 : vector<8x32xf32> to vector<8x32xbf16>
    %163 = vector.extract_strided_slice %162 {offsets = [0, 0], sizes = [8, 8], strides = [1, 1]} : vector<8x32xbf16> to vector<8x8xbf16>
    %c0_95 = arith.constant 0 : index
    %c0_96 = arith.constant 0 : index
    %c0_97 = arith.constant 0 : index
    %164 = vector.load %arg14[%c0_95, %c0_96, %c0_97] : memref<4x8x8xbf16, #tpu.memory_space<vmem>>, vector<1x8x8xbf16>
    %165 = vector.shape_cast %164 : vector<1x8x8xbf16> to vector<8x8xbf16>
    %166 = vector.shape_cast %163 : vector<8x8xbf16> to vector<1x8x8xbf16>
    tpu.vector_store %arg14[%c0_95, %c0_96, %c0_97], %166 {strides = array<i32>} : memref<4x8x8xbf16, #tpu.memory_space<vmem>>, vector<1x8x8xbf16>,
    %167 = vector.extract_strided_slice %162 {offsets = [0, 8], sizes = [8, 8], strides = [1, 1]} : vector<8x32xbf16> to vector<8x8xbf16>
    %c1_98 = arith.constant 1 : index
    %c0_99 = arith.constant 0 : index
    %c0_100 = arith.constant 0 : index
    %168 = vector.load %arg14[%c1_98, %c0_99, %c0_100] : memref<4x8x8xbf16, #tpu.memory_space<vmem>>, vector<1x8x8xbf16>
    %169 = vector.shape_cast %168 : vector<1x8x8xbf16> to vector<8x8xbf16>
    %170 = vector.shape_cast %167 : vector<8x8xbf16> to vector<1x8x8xbf16>
    tpu.vector_store %arg14[%c1_98, %c0_99, %c0_100], %170 {strides = array<i32>} : memref<4x8x8xbf16, #tpu.memory_space<vmem>>, vector<1x8x8xbf16>,
    %171 = vector.extract_strided_slice %162 {offsets = [0, 16], sizes = [8, 8], strides = [1, 1]} : vector<8x32xbf16> to vector<8x8xbf16>
    %c2_101 = arith.constant 2 : index
    %c0_102 = arith.constant 0 : index
    %c0_103 = arith.constant 0 : index
    %172 = vector.load %arg14[%c2_101, %c0_102, %c0_103] : memref<4x8x8xbf16, #tpu.memory_space<vmem>>, vector<1x8x8xbf16>
    %173 = vector.shape_cast %172 : vector<1x8x8xbf16> to vector<8x8xbf16>
    %174 = vector.shape_cast %171 : vector<8x8xbf16> to vector<1x8x8xbf16>
    tpu.vector_store %arg14[%c2_101, %c0_102, %c0_103], %174 {strides = array<i32>} : memref<4x8x8xbf16, #tpu.memory_space<vmem>>, vector<1x8x8xbf16>,
    %175 = vector.extract_strided_slice %162 {offsets = [0, 24], sizes = [8, 8], strides = [1, 1]} : vector<8x32xbf16> to vector<8x8xbf16>
    %c3_104 = arith.constant 3 : index
    %c0_105 = arith.constant 0 : index
    %c0_106 = arith.constant 0 : index
    %176 = vector.load %arg14[%c3_104, %c0_105, %c0_106] : memref<4x8x8xbf16, #tpu.memory_space<vmem>>, vector<1x8x8xbf16>
    %177 = vector.shape_cast %176 : vector<1x8x8xbf16> to vector<8x8xbf16>
    %178 = vector.shape_cast %175 : vector<8x8xbf16> to vector<1x8x8xbf16>
    tpu.vector_store %arg14[%c3_104, %c0_105, %c0_106], %178 {strides = array<i32>} : memref<4x8x8xbf16, #tpu.memory_space<vmem>>, vector<1x8x8xbf16>,
    %179 = arith.truncf %144 : vector<8x32xf32> to vector<8x32xbf16>
    %180 = vector.extract_strided_slice %179 {offsets = [0, 0], sizes = [8, 8], strides = [1, 1]} : vector<8x32xbf16> to vector<8x8xbf16>
    %c0_107 = arith.constant 0 : index
    %c0_108 = arith.constant 0 : index
    %c0_109 = arith.constant 0 : index
    %181 = vector.load %arg15[%c0_107, %c0_108, %c0_109] : memref<4x8x8xbf16, #tpu.memory_space<vmem>>, vector<1x8x8xbf16>
    %182 = vector.shape_cast %181 : vector<1x8x8xbf16> to vector<8x8xbf16>
    %183 = vector.shape_cast %180 : vector<8x8xbf16> to vector<1x8x8xbf16>
    tpu.vector_store %arg15[%c0_107, %c0_108, %c0_109], %183 {strides = array<i32>} : memref<4x8x8xbf16, #tpu.memory_space<vmem>>, vector<1x8x8xbf16>,
    %184 = vector.extract_strided_slice %179 {offsets = [0, 8], sizes = [8, 8], strides = [1, 1]} : vector<8x32xbf16> to vector<8x8xbf16>
    %c1_110 = arith.constant 1 : index
    %c0_111 = arith.constant 0 : index
    %c0_112 = arith.constant 0 : index
    %185 = vector.load %arg15[%c1_110, %c0_111, %c0_112] : memref<4x8x8xbf16, #tpu.memory_space<vmem>>, vector<1x8x8xbf16>
    %186 = vector.shape_cast %185 : vector<1x8x8xbf16> to vector<8x8xbf16>
    %187 = vector.shape_cast %184 : vector<8x8xbf16> to vector<1x8x8xbf16>
    tpu.vector_store %arg15[%c1_110, %c0_111, %c0_112], %187 {strides = array<i32>} : memref<4x8x8xbf16, #tpu.memory_space<vmem>>, vector<1x8x8xbf16>,
    %188 = vector.extract_strided_slice %179 {offsets = [0, 16], sizes = [8, 8], strides = [1, 1]} : vector<8x32xbf16> to vector<8x8xbf16>
    %c2_113 = arith.constant 2 : index
    %c0_114 = arith.constant 0 : index
    %c0_115 = arith.constant 0 : index
    %189 = vector.load %arg15[%c2_113, %c0_114, %c0_115] : memref<4x8x8xbf16, #tpu.memory_space<vmem>>, vector<1x8x8xbf16>
    %190 = vector.shape_cast %189 : vector<1x8x8xbf16> to vector<8x8xbf16>
    %191 = vector.shape_cast %188 : vector<8x8xbf16> to vector<1x8x8xbf16>
    tpu.vector_store %arg15[%c2_113, %c0_114, %c0_115], %191 {strides = array<i32>} : memref<4x8x8xbf16, #tpu.memory_space<vmem>>, vector<1x8x8xbf16>,
    %192 = vector.extract_strided_slice %179 {offsets = [0, 24], sizes = [8, 8], strides = [1, 1]} : vector<8x32xbf16> to vector<8x8xbf16>
    %c3_116 = arith.constant 3 : index
    %c0_117 = arith.constant 0 : index
    %c0_118 = arith.constant 0 : index
    %193 = vector.load %arg15[%c3_116, %c0_117, %c0_118] : memref<4x8x8xbf16, #tpu.memory_space<vmem>>, vector<1x8x8xbf16>
    %194 = vector.shape_cast %193 : vector<1x8x8xbf16> to vector<8x8xbf16>
    %195 = vector.shape_cast %192 : vector<8x8xbf16> to vector<1x8x8xbf16>
    tpu.vector_store %arg15[%c3_116, %c0_117, %c0_118], %195 {strides = array<i32>} : memref<4x8x8xbf16, #tpu.memory_space<vmem>>, vector<1x8x8xbf16>,
    %c0_119 = arith.constant 0 : index
    %c0_120 = arith.constant 0 : index
    %c0_121 = arith.constant 0 : index
    %196 = vector.load %arg13[%c0_119, %c0_120, %c0_121] : memref<4x8x8xbf16, #tpu.memory_space<vmem>>, vector<4x8x8xbf16>
    %c0_122 = arith.constant 0 : index
    %c0_123 = arith.constant 0 : index
    %c0_124 = arith.constant 0 : index
    %197 = vector.load %arg14[%c0_122, %c0_123, %c0_124] : memref<4x8x8xbf16, #tpu.memory_space<vmem>>, vector<4x8x8xbf16>
    %c0_125 = arith.constant 0 : index
    %c0_126 = arith.constant 0 : index
    %c0_127 = arith.constant 0 : index
    %198 = vector.load %arg15[%c0_125, %c0_126, %c0_127] : memref<4x8x8xbf16, #tpu.memory_space<vmem>>, vector<4x8x8xbf16>
    "tpu.trace_start"() <{level = 10 : i32, message = "hqd,hkd->hqk"}> : () -> ()
    %cst_128 = arith.constant dense<0.000000e+00> : vector<4x8x8xf32>
    %199 = tpu.matmul %196, %197, %cst_128 {dimension_numbers = #tpu.dot_dimension_numbers<[2], [2], [1], [1], [0, 0, 0, 1, 1, 1], [0], [0]>} : vector<4x8x8xbf16>, vector<4x8x8xbf16>, vector<4x8x8xf32> -> vector<4x8x8xf32>
    "tpu.trace_stop"() : () -> ()
    %cst_129 = arith.constant 0.353553385 : f32
    %200 = vector.broadcast %cst_129 : f32 to vector<4x8x8xf32>
    %201 = arith.mulf %199, %200 : vector<4x8x8xf32>
    %cst_130 = arith.constant dense<0xFF800000> : vector<4x8xf32>
    %202 = vector.multi_reduction <maximumf>, %201, %cst_130 [2] : vector<4x8x8xf32> to vector<4x8xf32>
    %203 = vector.shape_cast %202 : vector<4x8xf32> to vector<4x8x1xf32>
    %204 = vector.broadcast %203 : vector<4x8x1xf32> to vector<4x8x8xf32>
    %205 = arith.subf %201, %204 : vector<4x8x8xf32>
    %206 = math.exp %205 : vector<4x8x8xf32>
    %cst_131 = arith.constant dense<0.000000e+00> : vector<4x8xf32>
    %207 = vector.multi_reduction <add>, %206, %cst_131 [2] : vector<4x8x8xf32> to vector<4x8xf32>
    %208 = vector.shape_cast %207 : vector<4x8xf32> to vector<4x8x1xf32>
    %209 = tpu.reciprocal %208 {approx = true} : vector<4x8x1xf32> -> vector<4x8x1xf32>
    %210 = vector.broadcast %209 : vector<4x8x1xf32> to vector<4x8x8xf32>
    %211 = arith.mulf %206, %210 : vector<4x8x8xf32>
    %212 = arith.truncf %211 : vector<4x8x8xf32> to vector<4x8x8xbf16>
    "tpu.trace_start"() <{level = 10 : i32, message = "hqk,hkd->hqd"}> : () -> ()
    %cst_132 = arith.constant dense<0.000000e+00> : vector<4x8x8xf32>
    %213 = tpu.matmul %212, %198, %cst_132 {dimension_numbers = #tpu.dot_dimension_numbers<[2], [1], [1], [2], [0, 0, 0, 1, 1, 2], [0], [0]>} : vector<4x8x8xbf16>, vector<4x8x8xbf16>, vector<4x8x8xf32> -> vector<4x8x8xf32>
    "tpu.trace_stop"() : () -> ()
    %214 = vector.extract_strided_slice %213 {offsets = [0, 0, 0], sizes = [1, 8, 8], strides = [1, 1, 1]} : vector<4x8x8xf32> to vector<1x8x8xf32>
    %215 = vector.shape_cast %214 : vector<1x8x8xf32> to vector<8x8xf32>
    %c0_133 = arith.constant 0 : index
    %c0_134 = arith.constant 0 : index
    %216 = vector.load %arg16[%c0_133, %c0_134] : memref<8x32xf32, #tpu.memory_space<vmem>>, vector<8x8xf32>
    tpu.vector_store %arg16[%c0_133, %c0_134], %215 {strides = array<i32>} : memref<8x32xf32, #tpu.memory_space<vmem>>, vector<8x8xf32>,
    %217 = vector.extract_strided_slice %213 {offsets = [1, 0, 0], sizes = [1, 8, 8], strides = [1, 1, 1]} : vector<4x8x8xf32> to vector<1x8x8xf32>
    %218 = vector.shape_cast %217 : vector<1x8x8xf32> to vector<8x8xf32>
    %c0_135 = arith.constant 0 : index
    %c8_136 = arith.constant 8 : index
    %219 = vector.load %arg16[%c0_135, %c8_136] : memref<8x32xf32, #tpu.memory_space<vmem>>, vector<8x8xf32>
    tpu.vector_store %arg16[%c0_135, %c8_136], %218 {strides = array<i32>} : memref<8x32xf32, #tpu.memory_space<vmem>>, vector<8x8xf32>,
    %220 = vector.extract_strided_slice %213 {offsets = [2, 0, 0], sizes = [1, 8, 8], strides = [1, 1, 1]} : vector<4x8x8xf32> to vector<1x8x8xf32>
    %221 = vector.shape_cast %220 : vector<1x8x8xf32> to vector<8x8xf32>
    %c0_137 = arith.constant 0 : index
    %c16_138 = arith.constant 16 : index
    %222 = vector.load %arg16[%c0_137, %c16_138] : memref<8x32xf32, #tpu.memory_space<vmem>>, vector<8x8xf32>
    tpu.vector_store %arg16[%c0_137, %c16_138], %221 {strides = array<i32>} : memref<8x32xf32, #tpu.memory_space<vmem>>, vector<8x8xf32>,
    %223 = vector.extract_strided_slice %213 {offsets = [3, 0, 0], sizes = [1, 8, 8], strides = [1, 1, 1]} : vector<4x8x8xf32> to vector<1x8x8xf32>
    %224 = vector.shape_cast %223 : vector<1x8x8xf32> to vector<8x8xf32>
    %c0_139 = arith.constant 0 : index
    %c24_140 = arith.constant 24 : index
    %225 = vector.load %arg16[%c0_139, %c24_140] : memref<8x32xf32, #tpu.memory_space<vmem>>, vector<8x8xf32>
    tpu.vector_store %arg16[%c0_139, %c24_140], %224 {strides = array<i32>} : memref<8x32xf32, #tpu.memory_space<vmem>>, vector<8x8xf32>,
    %c0_141 = arith.constant 0 : index
    %c0_142 = arith.constant 0 : index
    %226 = vector.load %arg16[%c0_141, %c0_142] : memref<8x32xf32, #tpu.memory_space<vmem>>, vector<8x32xf32>
    %227 = arith.truncf %226 : vector<8x32xf32> to vector<8x32xbf16>
    %c0_143 = arith.constant 0 : index
    %c0_144 = arith.constant 0 : index
    %c0_145 = arith.constant 0 : index
    %228 = vector.load %arg7[%c0_143, %c0_144, %c0_145] : memref<1x32x32xbf16, #tpu.memory_space<vmem>>, vector<1x32x32xbf16>
    %229 = vector.shape_cast %228 : vector<1x32x32xbf16> to vector<32x32xbf16>
    %cst_146 = arith.constant dense<0.000000e+00> : vector<8x32xf32>
    %230 = tpu.matmul %227, %229, %cst_146 {dimension_numbers = #tpu.dot_dimension_numbers<[1], [0], [0], [1], [0, 0, 1, 1], [], []>} : vector<8x32xbf16>, vector<32x32xbf16>, vector<8x32xf32> -> vector<8x32xf32>
    %231 = vector.broadcast %10 : vector<1x32xf32> to vector<8x32xf32>
    %232 = arith.addf %230, %231 : vector<8x32xf32>
    %233 = arith.addf %4, %232 : vector<8x32xf32>
    %cst_147 = arith.constant dense<0.000000e+00> : vector<8xf32>
    %234 = vector.multi_reduction <add>, %233, %cst_147 [1] : vector<8x32xf32> to vector<8xf32>
    %235 = vector.shape_cast %234 : vector<8xf32> to vector<8x1xf32>
    %cst_148 = arith.constant 3.200000e+01 : f32
    %236 = vector.broadcast %cst_148 : f32 to vector<8x1xf32>
    %237 = arith.divf %235, %236 : vector<8x1xf32>
    %238 = vector.broadcast %237 : vector<8x1xf32> to vector<8x32xf32>
    %239 = arith.subf %233, %238 : vector<8x32xf32>
    %240 = arith.mulf %239, %239 : vector<8x32xf32>
    %cst_149 = arith.constant dense<0.000000e+00> : vector<8xf32>
    %241 = vector.multi_reduction <add>, %240, %cst_149 [1] : vector<8x32xf32> to vector<8xf32>
    %242 = vector.shape_cast %241 : vector<8xf32> to vector<8x1xf32>
    %cst_150 = arith.constant 0.0322580636 : f32
    %243 = vector.broadcast %cst_150 : f32 to vector<8x1xf32>
    %244 = arith.mulf %242, %243 : vector<8x1xf32>
    %245 = math.sqrt %244 : vector<8x1xf32>
    %cst_151 = arith.constant 9.99999997E-7 : f32
    %246 = vector.broadcast %cst_151 : f32 to vector<8x1xf32>
    %247 = arith.addf %245, %246 : vector<8x1xf32>
    %248 = tpu.reciprocal %247 : vector<8x1xf32> -> vector<8x1xf32>
    %249 = vector.broadcast %11 : vector<1x32xf32> to vector<8x32xf32>
    %250 = vector.broadcast %248 : vector<8x1xf32> to vector<8x32xf32>
    %251 = arith.mulf %249, %250 : vector<8x32xf32>
    %252 = arith.mulf %239, %251 : vector<8x32xf32>
    %253 = vector.broadcast %12 : vector<1x32xf32> to vector<8x32xf32>
    %254 = arith.addf %252, %253 : vector<8x32xf32>
    %255 = arith.truncf %254 : vector<8x32xf32> to vector<8x32xbf16>
    %c0_152 = arith.constant 0 : index
    %c0_153 = arith.constant 0 : index
    %c0_154 = arith.constant 0 : index
    %256 = vector.load %arg8[%c0_152, %c0_153, %c0_154] : memref<1x32x64xbf16, #tpu.memory_space<vmem>>, vector<1x32x64xbf16>
    %257 = vector.shape_cast %256 : vector<1x32x64xbf16> to vector<32x64xbf16>
    %cst_155 = arith.constant dense<0.000000e+00> : vector<8x64xf32>
    %258 = tpu.matmul %255, %257, %cst_155 {dimension_numbers = #tpu.dot_dimension_numbers<[1], [0], [0], [1], [0, 0, 1, 1], [], []>} : vector<8x32xbf16>, vector<32x64xbf16>, vector<8x64xf32> -> vector<8x64xf32>
    %259 = vector.broadcast %17 : vector<1x64xf32> to vector<8x64xf32>
    %260 = arith.addf %258, %259 : vector<8x64xf32>
    %cst_156 = arith.constant 0.000000e+00 : f32
    %261 = vector.broadcast %cst_156 : f32 to vector<8x64xf32>
    %262 = arith.maximumf %260, %261 : vector<8x64xf32>
    %263 = arith.truncf %262 : vector<8x64xf32> to vector<8x64xbf16>
    %c0_157 = arith.constant 0 : index
    %c0_158 = arith.constant 0 : index
    %c0_159 = arith.constant 0 : index
    %264 = vector.load %arg9[%c0_157, %c0_158, %c0_159] : memref<1x64x32xbf16, #tpu.memory_space<vmem>>, vector<1x64x32xbf16>
    %265 = vector.shape_cast %264 : vector<1x64x32xbf16> to vector<64x32xbf16>
    %cst_160 = arith.constant dense<0.000000e+00> : vector<8x32xf32>
    %266 = tpu.matmul %263, %265, %cst_160 {dimension_numbers = #tpu.dot_dimension_numbers<[1], [0], [0], [1], [0, 0, 1, 1], [], []>} : vector<8x64xbf16>, vector<64x32xbf16>, vector<8x32xf32> -> vector<8x32xf32>
    %267 = vector.broadcast %13 : vector<1x32xf32> to vector<8x32xf32>
    %268 = arith.addf %266, %267 : vector<8x32xf32>
    %269 = arith.addf %254, %268 : vector<8x32xf32>
    %cst_161 = arith.constant dense<0.000000e+00> : vector<8xf32>
    %270 = vector.multi_reduction <add>, %269, %cst_161 [1] : vector<8x32xf32> to vector<8xf32>
    %271 = vector.shape_cast %270 : vector<8xf32> to vector<8x1xf32>
    %cst_162 = arith.constant 3.200000e+01 : f32
    %272 = vector.broadcast %cst_162 : f32 to vector<8x1xf32>
    %273 = arith.divf %271, %272 : vector<8x1xf32>
    %274 = vector.broadcast %273 : vector<8x1xf32> to vector<8x32xf32>
    %275 = arith.subf %269, %274 : vector<8x32xf32>
    %276 = arith.mulf %275, %275 : vector<8x32xf32>
    %cst_163 = arith.constant dense<0.000000e+00> : vector<8xf32>
    %277 = vector.multi_reduction <add>, %276, %cst_163 [1] : vector<8x32xf32> to vector<8xf32>
    %278 = vector.shape_cast %277 : vector<8xf32> to vector<8x1xf32>
    %cst_164 = arith.constant 0.0322580636 : f32
    %279 = vector.broadcast %cst_164 : f32 to vector<8x1xf32>
    %280 = arith.mulf %278, %279 : vector<8x1xf32>
    %281 = math.sqrt %280 : vector<8x1xf32>
    %cst_165 = arith.constant 9.99999997E-7 : f32
    %282 = vector.broadcast %cst_165 : f32 to vector<8x1xf32>
    %283 = arith.addf %281, %282 : vector<8x1xf32>
    %284 = tpu.reciprocal %283 : vector<8x1xf32> -> vector<8x1xf32>
    %285 = vector.broadcast %14 : vector<1x32xf32> to vector<8x32xf32>
    %286 = vector.broadcast %284 : vector<8x1xf32> to vector<8x32xf32>
    %287 = arith.mulf %285, %286 : vector<8x32xf32>
    %288 = arith.mulf %275, %287 : vector<8x32xf32>
    %289 = vector.broadcast %15 : vector<1x32xf32> to vector<8x32xf32>
    %290 = arith.addf %288, %289 : vector<8x32xf32>
    %c0_166 = arith.constant 0 : index
    %c0_167 = arith.constant 0 : index
    %291 = vector.load %arg12[%c0_166, %c0_167] : memref<8x32xf32, #tpu.memory_space<vmem>>, vector<8x32xf32>
    tpu.vector_store %arg12[%c0_166, %c0_167], %290 {strides = array<i32>} : memref<8x32xf32, #tpu.memory_space<vmem>>, vector<8x32xf32>,
    return
  }
  func.func @transform_0(%arg0: i32, %arg1: i32) -> (i32, i32) {
    %c0_i32 = arith.constant 0 : i32
    %c0_i32_0 = arith.constant 0 : i32
    return %arg0, %c0_i32 : i32, i32
  }
  func.func @transform_1(%arg0: i32, %arg1: i32) -> (i32, i32) {
    %c0_i32 = arith.constant 0 : i32
    %c0_i32_0 = arith.constant 0 : i32
    return %arg0, %c0_i32 : i32, i32
  }
  func.func @transform_2(%arg0: i32, %arg1: i32) -> (i32, i32, i32) {
    %c0_i32 = arith.constant 0 : i32
    %c0_i32_0 = arith.constant 0 : i32
    %c0_i32_1 = arith.constant 0 : i32
    return %arg1, %c0_i32, %c0_i32_0 : i32, i32, i32
  }
  func.func @transform_3(%arg0: i32, %arg1: i32) -> (i32, i32, i32) {
    %c0_i32 = arith.constant 0 : i32
    %c0_i32_0 = arith.constant 0 : i32
    %c0_i32_1 = arith.constant 0 : i32
    return %arg1, %c0_i32, %c0_i32_0 : i32, i32, i32
  }
  func.func @transform_4(%arg0: i32, %arg1: i32) -> (i32, i32, i32) {
    %c0_i32 = arith.constant 0 : i32
    %c0_i32_0 = arith.constant 0 : i32
    %c0_i32_1 = arith.constant 0 : i32
    return %arg1, %c0_i32, %c0_i32_0 : i32, i32, i32
  }
  func.func @transform_5(%arg0: i32, %arg1: i32) -> (i32, i32, i32) {
    %c0_i32 = arith.constant 0 : i32
    %c0_i32_0 = arith.constant 0 : i32
    %c0_i32_1 = arith.constant 0 : i32
    return %arg1, %c0_i32, %c0_i32_0 : i32, i32, i32
  }
  func.func @transform_6(%arg0: i32, %arg1: i32) -> (i32, i32, i32) {
    %c0_i32 = arith.constant 0 : i32
    %c0_i32_0 = arith.constant 0 : i32
    %c0_i32_1 = arith.constant 0 : i32
    return %arg1, %c0_i32, %c0_i32_0 : i32, i32, i32
  }
  func.func @transform_7(%arg0: i32, %arg1: i32) -> (i32, i32, i32) {
    %c0_i32 = arith.constant 0 : i32
    %c0_i32_0 = arith.constant 0 : i32
    %c0_i32_1 = arith.constant 0 : i32
    return %arg1, %c0_i32, %c0_i32_0 : i32, i32, i32
  }
  func.func @transform_8(%arg0: i32, %arg1: i32) -> (i32, i32, i32) {
    %c0_i32 = arith.constant 0 : i32
    %c0_i32_0 = arith.constant 0 : i32
    %c0_i32_1 = arith.constant 0 : i32
    return %arg1, %c0_i32, %c0_i32_0 : i32, i32, i32
  }
  func.func @transform_9(%arg0: i32, %arg1: i32) -> (i32, i32, i32) {
    %c0_i32 = arith.constant 0 : i32
    %c0_i32_0 = arith.constant 0 : i32
    %c0_i32_1 = arith.constant 0 : i32
    return %arg1, %c0_i32, %c0_i32_0 : i32, i32, i32
  }
  func.func @transform_10(%arg0: i32, %arg1: i32) -> (i32, i32) {
    %c0_i32 = arith.constant 0 : i32
    %c0_i32_0 = arith.constant 0 : i32
    return %arg0, %c0_i32 : i32, i32
  }
}

</mosaic_0001>

<bundles_post_ra>
// kernel: tpu_custom_call.1
= control target key start
LH: loop header
LB: loop body
LE: loop exit
PB: predicated region body
PF: predicated region fallthrough
CT: control target
= control target key end

     0   :  { %s2890_s0 = inlined_call_operand.vmem [shape: f32[16,32], index: 0, kind: input, shape index: {}]   ;;  %s2891_s1 = inlined_call_operand.hbm [shape: f32[16,32], index: 1, kind: input, shape index: {}]   ;;  %s2892_s2 = inlined_call_operand.vmem [shape: bf16[2,32,96], index: 2, kind: input, shape index: {}]   ;;  %s2893_s3 = inlined_call_operand.vmem [shape: bf16[2,32,32], index: 3, kind: input, shape index: {}]   ;;  %s2894_s4 = inlined_call_operand.vmem [shape: bf16[2,32,96], index: 4, kind: input, shape index: {}]   ;;  %s2895_s5 = inlined_call_operand.hbm [shape: bf16[2,32,32], index: 5, kind: input, shape index: {}]   ;;  %s2896_s6 = inlined_call_operand.hbm [shape: bf16[2,32,64], index: 6, kind: input, shape index: {}]   ;;  %s2897_s7 = inlined_call_operand.vmem [shape: bf16[2,64,32], index: 7, kind: input, shape index: {}]   ;;  %s2898_s8 = inlined_call_operand.vmem [shape: f32[2,9,32], index: 8, kind: input, shape index: {}]   ;;  %s2899_s9 = inlined_call_operand.vmem [shape: f32[2,1,64], index: 9, kind: input, shape index: {}]   ;;  %s2900_s10 = inlined_call_operand.hbm [shape: f32[16,32], index: 10, kind: output, shape index: {}]  }
   0x1   :  { %2916 = sst [smem:[#allocation29_spill]] %s2890_s0 }
   0x2   :  { %2917 = sst [smem:[#allocation30_spill]] %s2891_s1 }
   0x3   :  { %2918 = sst [smem:[#allocation31_spill]] %s2892_s2 }
   0x4   :  { %2919 = sst [smem:[#allocation32_spill]] %s2893_s3 }
   0x5   :  { %2920 = sst [smem:[#allocation33_spill]] %s2894_s4 }
   0x6   :  { %2921 = sst [smem:[#allocation34_spill]] %s2895_s5 }
   0x7   :  { %2922 = sst [smem:[#allocation35_spill]] %s2896_s6 }
   0x8   :  { %2923 = sst [smem:[#allocation36_spill]] %s2897_s7 }
   0x9   :  { %2924 = sst [smem:[#allocation37_spill]] %s2898_s8 }
   0xa   :  { %2925 = sst [smem:[#allocation38_spill]] %s2899_s9 }
   0xb   :  { %2926 = sst [smem:[#allocation39_spill]] %s2900_s10 }
   0xc   :  { %15 = vsyncpa [#allocation7], 0 }
   0xd   :  { %17 = vsyncpa [#allocation7 + $0x1], 0 }
   0xe   :  { %18 = vsyncpa [#allocation10], 0 }
   0xf   :  { %20 = vsyncpa [#allocation10 + $0x1], 0 }
  0x10   :  { %21 = vsyncpa [#allocation8], 0 }
  0x11   :  { %23 = vsyncpa [#allocation8 + $0x1], 0  ;;  %s2392_s13 = smov 0   ;;  %s2394_s14 = smov 0  }
  0x12   :  { %s2396_s15 = smov 0   ;;  %s2398_s16 = smov 0  }
  0x13   :  { %s2400_s17 = smov 0   ;;  %s2402_s18 = smov 0  }
  0x14   :  { %s2404_s19 = smov 0   ;;  %s2406_s20 = smov 0  }
  0x15   :  { %s2408_s21 = smov 0   ;;  %s2410_s22 = smov 0  }
  0x16   :  { %s2412_s23 = smov 0  }
  0x17 LB: > { %2927 = sst [smem:[#allocation16_spill]] %s2282_s14  ;;  %s38_s24 = sadd.s32 1, %s2310_s21  ;;  %s2318_s23 = sphi %s2412_s23, %s29_s23   ;;  %s2314_s22 = sphi %s2410_s22, %s2976_s22   ;;  %s2310_s21 = sphi %s2408_s21, %s2975_s21   ;;  %s2306_s20 = sphi %s2406_s20, %s2974_s20   ;;  %s2302_s19 = sphi %s2404_s19, %s2973_s19   ;;  %s2298_s18 = sphi %s2402_s18, %s2972_s18   ;;  %s2294_s17 = sphi %s2400_s17, %s2971_s17   ;;  %s2290_s16 = sphi %s2398_s16, %s2970_s16   ;;  %s2286_s15 = sphi %s2396_s15, %s2969_s15   ;;  %s2282_s14 = sphi %s2394_s14, %s2968_s14   ;;  %s2278_s13 = sphi %s2392_s13, %s2967_s13  }
  0x18   : > { %2928 = sst [smem:[#allocation17_spill]] %s2286_s15  ;;  %p82_p0 = scmp.eq.s32.totalorder %s2318_s23, 0 }
  0x19   : > { %2929 = sst [smem:[#allocation18_spill]] %s2290_s16  ;;  %p2449_p1 = scmp.ge.s32.totalorder %s38_s24, 2 }
  0x1a   : > { %2930 = sst [smem:[#allocation19_spill]] %s2294_s17  ;;  %s178_s26 = sadd.s32 1, %s2286_s15 }
  0x1b   : > { %2931 = sst [smem:[#allocation20_spill]] %s2298_s18  ;;  %p185_p2 = scmp.ne.s32.totalorder %s2286_s15, %s2282_s14 }
  0x1c   : > { %2932 = sst [smem:[#allocation21_spill]] %s2310_s21  ;;  %s2978_s24 = smov (%p2449_p1, %s38_s24), 0 }
  0x1d   : > { %2933 = sst [smem:[#allocation22_spill]] %s2314_s22  ;;  %p2462_p3 = por %p185_p2, %p82_p0 }
  0x1e   : > { %2934 = sst [smem:[#allocation23_spill]] %s2318_s23  ;;  %s175_s28 = ssub.s32 %s2310_s21, %s2978_s24 }
  0x1f   : > { %2936 = sst [smem:[#allocation24_spill]] %s2978_s24  ;;  %p1947_p4 = scmp.lt.s32.totalorder %s2318_s23, 4 }
  0x20   : > { %p176_p5 = scmp.eq.s32.totalorder %s175_s28, 0  ;;  %s395_s29 = sand.u32 1, %s2318_s23  }
  0x21   : > { %s397_s30 = sand.u32 1, %s2286_s15   ;;  %s1904_s10 = sshll.u32 %s2310_s21, 4 }
  0x22   : > { %s2472_s11 = scalar_select %p176_p5, %s2286_s15, %s178_s26  }
  0x23   : > { %s1798_s12 = sshll.u32 %s397_s30, 4  ;;  %s2939_s5 = sld [smem:[#allocation34_spill]] }
  0x24   : > { %2938 = sst [smem:[#allocation25_spill]] %s2472_s11  ;;  %s399_s3 = scalar_lea.vmem [#allocation9], %s1798_s12 }
  0x25   : > { %s407_s2 = sshll.u32 %s399_s3, 4  ;;  %p2482_p6 = pnand %p1947_p4, %p2462_p3  ;;  %s408_s2 = int_to_ptr.vmem [resolvable:$true] %s407_s2 }
  0x26   : > { %s2941_s6 = sld [smem:[#allocation35_spill]]  ;;  %s2902_s3 = smov 64  }
  0x27   : > { %s2903_s9 = smov 4   ;;  %p191_p7 = scmp.ne.s32.totalorder %s2282_s14, %s2278_s13 }
  0x28   : > { %s421_s27 = scalar_lea.vmem [#allocation11], %s1798_s12  ;;  %p1804_p8 = scmp.ge.s32.totalorder %s2318_s23, 1 }
  0x29   : > { %s404_s7 = scalar_lea.hbm %s2939_s5, %s1904_s10  ;;  %p459_p9 = scmp.lt.s32.totalorder %s2318_s23, 5 }
  0x2a   : > { %s405_s4 = sshll.u32 %s404_s7, 4  ;;  %s2489_s7 = scalar_lea.sflag [#allocation10], %s395_s29  ;;  %s406_s4 = int_to_ptr.hbm [resolvable:$true] %s405_s4 }
  0x2b   : > { %1939 = dma.hbm_to_vmem [thread:$0]  (!%p2482_p6), %s406_s4, 256, %s408_s2, %s2489_s7, %s2902_s3, %s2902_s3, %s2903_s9  }
  0x2c   : > { %s426_s8 = scalar_lea.hbm %s2941_s6, %s1904_s10  ;;  %s2501_s29 = sshll.u32 %s421_s27, 4  ;;  %s430_s29 = int_to_ptr.vmem [resolvable:$true] %s2501_s29 }
  0x2d   : > { %s427_s10 = sshll.u32 %s426_s8, 4  ;;  %p2505_p10 = pnand %p1804_p8, %p459_p9  ;;  %s2499_s10 = int_to_ptr.hbm [resolvable:$true] %s427_s10 }
  0x2e   : > { %s2511_s4 = sadd.s32 4294967295, %s2318_s23   ;;  %s41_s12 = sadd.s32 1, %s2314_s22 }
  0x2f   : > { %s2980_s12 = smov (!%p2449_p1, %s41_s12), %s2314_s22  ;;  %s1793_s26 = sadd.s32 4294967294, %s2318_s23  }
  0x30   : > { %s74_s30 = sadd.s32 1, %s2298_s18  ;;  %p43_p11 = scmp.ge.s32.totalorder %s2980_s12, 2 }
  0x31   : > { %p87_p12 = scmp.ne.s32.totalorder %s2294_s17, %s2290_s16  ;;  %p81_p13 = scmp.ne.s32.totalorder %s2298_s18, %s2294_s17 }
  0x32   : > { %p88_p2 = scmp.eq.s32.totalorder %s2511_s4, 0  ;;  %s2982_s12 = smov (%p43_p11, %s2980_s12), 0 }
  0x33   : > { %2943 = sst [smem:[#allocation26_spill]] %s2982_s12  ;;  %s71_s27 = ssub.s32 %s2314_s22, %s2982_s12 }
  0x34   : > { %p2529_p3 = por %p88_p2, %p87_p12  ;;  %p2536_p1 = por %p191_p7, %p88_p2 }
  0x35   : > { %p319_p5 = scmp.eq.s32.totalorder %s2511_s4, 3  ;;  %p72_p8 = scmp.eq.s32.totalorder %s71_s27, 0 }
  0x36   : > { %p325_p9 = scmp.eq.s32.totalorder %s1793_s26, 3  ;;  %s352_s9 = sand.u32 1, %s2298_s18  }
  0x37   : > { %p2543_p11 = por %p319_p5, %p81_p13  ;;  %p83_p7 = por %p82_p0, %p81_p13 }
  0x38   : > { %s2549_s5 = scalar_select %p72_p8, %s2298_s18, %s74_s30  }
  0x39   : > { %p2556_p2 = por %p325_p9, %p87_p12  ;;  %s1796_s27 = sshll.u32 %s352_s9, 3 }
  0x3a   : > { %2947 = sst [smem:[#allocation27_spill]] %s2549_s5  ;;  %s1797_s6 = sshll.u32 %s2314_s22, 3 }
  0x3b   : > { %s2948_s13 = scalar_select %p2556_p2, 1, 0 }
  0x3c   : > { %s2950_s1 = sld [smem:[#allocation30_spill]]  ;;  %s356_s11 = scalar_lea.vmem [#allocation6], %s1796_s27 }
  0x3d   : > { %2949 = sst [smem:[#allocation28_spill]] %s2948_s13  ;;  %s364_s15 = sshll.u32 %s356_s11, 4  ;;  %s365_s15 = int_to_ptr.vmem [resolvable:$true] %s364_s15 }
  0x3e   : > { %p1934_p5 = pnand %p1947_p4, %p83_p7  ;;  %s2951_s30 = smov 4  }
  0x3f   : > { %s2952_s5 = smov 64   ;;  %s353_s18 = scalar_lea.sflag [#allocation7], %s352_s9 }
  0x40   : > { %1942 = dma.hbm_to_vmem [thread:$0]  (!%p2482_p6), %s2499_s10, 256, %s430_s29, %s2489_s7, %s2952_s5, %s2952_s5, %s2951_s30  }
  0x41   : > { %463 = sbr.rel (%p2505_p10) target bundleno = 3092 (0xc14), region = 60 }
  0x42   : > { %s360_s26 = scalar_lea.hbm %s2950_s1, %s1797_s6  ;;  %s2578_s6 = sand.u32 (!%p2505_p10), 1, %s2294_s17  }
  0x43   : > { %s362_s21 = sshll.u32 %s360_s26, 4  ;;  %s1805_s24 = sshll.u32 (!%p2505_p10), %s2578_s6, 3  ;;  %s363_s21 = int_to_ptr.hbm [resolvable:$true] %s362_s21 }
  0x44   : > { %1936 = dma.hbm_to_vmem [thread:$0]  (!%p1934_p5), %s363_s21, 128, %s365_s15, %s353_s18  }
  0x45   : > { %s466_s11 = scalar_lea.sflag (!%p2505_p10), [#allocation7], %s2578_s6  ;;  %s2582_s12 = scalar_lea.vmem (!%p2505_p10), [#allocation6], %s1805_s24 }
  0x46   : > { %2265 = dma.done.wait (%p2529_p3), %s466_s11, 128  }
  0x47   : > { %2267 = vsyncadd (%p2529_p3), %s466_s11, 4294967168  ;;  %s475_s5 = sand.u32 1, %s2511_s4   ;;  %s477_s15 = sand.u32 1, %s2282_s14  }
  0x48   : > { %s2590_s18 = sshll.u32 %s477_s15, 4  ;;  %s476_s21 = scalar_lea.sflag [#allocation10], %s475_s5 }
  0x49   : > { %2269 = dma.done.wait (%p2536_p1), %s476_s21, 512  }
  0x4a   : > { %2271 = vsyncadd (%p2536_p1), %s476_s21, 4294966784  ;;  %p569_p0 = scmp.lt.s32.totalorder %s2306_s20, 1  ;;  %p573_p4 = scmp.lt.s32.totalorder %s2302_s19, 1 }
  0x4b   : > { %s2953_s0 = sld [smem:[#allocation29_spill]]  ;;  %s489_s16 = scalar_lea.vmem [#allocation11], %s2590_s18 }
  0x4c   : > { %s570_s7 = scalar_select %p569_p0, %s2306_s20, 1 }
  0x4d   : > { %s2601_s9 = scalar_select %p573_p4, %s2302_s19, 1 }
  0x4e   : > { %s1809_s10 = sshll.u32 %s570_s7, 3  ;;  %s2954_s26 = sld [smem:[#allocation31_spill]] }
  0x4f   : > { %s1906_s8 = sshll.u32 %s2601_s9, 4  ;;  %s2955_s15 = sld [smem:[#allocation32_spill]] }
  0x50   : > { %s2956_s22 = sld [smem:[#allocation33_spill]]  ;;  %s1909_s7 = sshll.u32 %s2601_s9, 5 }
  0x51   : > { %s572_s4 = scalar_lea.vmem %s2953_s0, %s1809_s10  ;;  %s2957_s29 = sld [smem:[#allocation36_spill]] }
  0x52   : > { %s2958_s25 = sld [smem:[#allocation37_spill]]  ;;  %s2636_s23 = scalar_lea.vmem [#allocation12], %s1805_s24 }
  0x53   : > { %s2959_s5 = sld [smem:[#allocation38_spill]]  ;;  %p1820_p6 = scmp.ne.s32.totalorder %s2302_s19, 0 }
  0x54   : > { %s577_s30 = scalar_lea.vmem %s2954_s26, %s1906_s8 }
  0x55   : > { %s2613_s21 = scalar_lea.vmem %s2955_s15, %s1906_s8  ;;  %605 = sbr.rel (%p1820_p6) target bundleno = 92 (0x5c), region = 76 }
  0x56   : > { %s2618_s17 = scalar_lea.vmem %s2956_s22, %s1906_s8 }
  0x57   : > { %s2624_s10 = scalar_lea.vmem %s2957_s29, %s1909_s7 }
  0x58   : > { %s2629_s27 = scalar_lea.vmem %s2958_s25, %s1906_s8 }
  0x59   : > { %s600_s15 = scalar_lea.vmem %s2959_s5, %s2601_s9 }
  0x5a   : > { %v606_v0 = vld [vmem:[%s572_s4] sm:$0xff]  ;;  %vm607_vm0 = vcmask 261120  }
  0x5b   : > { %608 = vst.msk [vmem:[%s2636_s23] sm:$0xff] %vm607_vm0, %v606_v0 }
  0x5c PF: > { %v1912_v1 = vld [vmem:[%s577_s30 + $0x8] sm:$0xff]  ;;  %v1911_v2 = vld [vmem:[%s577_s30] sm:$0xff]  ;;  %vm631_vm1 = vcmask 261120   ;;  %vm649_vm2 = vcmask 60416   ;;  %s2322_s0 = smov 72   ;;  %s2323_s1 = smov 120  }
  0x5d   : > { %641 = vmatpush.bf16.msra.mxu0 %v1912_v1  ;;  %s2324_s14 = smov 88   ;;  %s2325_s19 = smov 104   ;;  %vm717_vm3 = vcmask 64512   ;;  %vm849_vm4 = vcmask 1043456   ;;  %vm928_vm5 = vcmask 130112   ;;  %vm934_vm6 = vcmask 195712  }
  0x5e   : > { %s2326_s22 = smov 112   ;;  %s2327_s13 = smov 80   ;;  %vm940_vm7 = vcmask 261312  }
  0x5f   : > { %s2328_s24 = smov 96   ;;  %s2329_s28 = smov 48  }
  0x60   : > { %s2330_s4 = smov 64   ;;  %s2331_s8 = smov 56  }
  0x61   : > { %642 = vmatpush.bf16.msra.mxu0 %v1911_v2  ;;  %s2332_s30 = smov 40   ;;  %s2333_s7 = smov 8  }
  0x62   : > { %v2641_v3 = vld [vmem:[%s2636_s23] sm:$0xff]  ;;  %s1901_s9 = sshll.u32 %s2306_s20, 3  ;;  %s2963_s26 = sld [smem:[#allocation39_spill]] }
  0x63   : > { %v614_v4 = vpack.c.bf16 %v2641_v3, %v2641_v3  ;;  %s1584_s5 = sshll.u32 %s2636_s23, 4  ;;  %s1585_s5 = int_to_ptr.vmem [resolvable:$true] %s1584_s5 }
  0x65   : > { %1829 = vmatmul.msk.bf16.vlgmr.msra.gmra.mxu0 %vm631_vm1, %v614_v4 }
  0x68   : > { %s1582_s11 = scalar_lea.hbm %s2963_s26, %s1901_s9 }
  0x69   : > { %s1586_s20 = sshll.u32 %s1582_s11, 4  ;;  %s1587_s20 = int_to_ptr.hbm [resolvable:$true] %s1586_s20 }
  0xe2   : > { %v644_v5 = vpop.f32.mrf.mxu0 }
  0xe3   : > { %v2646_v6 = vpack.c.bf16 %v644_v5, %v644_v5 }
  0xe5   : > { %681 = vrot.lane.b32.xlu2 %v2646_v6, %s2322_s0  ;;  %652 = vrot.lane.b32.xlu1 %v2646_v6, %s2323_s1  ;;  %650 = vst.msk [vmem:[#allocation2] sm:$0xf] %vm649_vm2, %v2646_v6 }
  0xe6   : > { %671 = vrot.lane.b32.xlu0 %v2646_v6, %s2324_s14 }
  0xea   : > { %v646_v7 = vpop.f32.mrf.mxu0 }
  0xec   : > { %v705_v26 = vld [vmem:[#allocation2] sm:$0xf] }
  0xed   : > { %662 = vrot.lane.b32.xlu2 %v2646_v6, %s2325_s19  ;;  %657 = vrot.lane.b32.xlu1 %v2646_v6, %s2326_s22 }
  0xee   : > { %676 = vrot.lane.b32.xlu0 %v2646_v6, %s2327_s13 }
  0xf6   : > { %667 = vrot.lane.b32.xlu0 %v2646_v6, %s2328_s24 }
 0x13f   : > { %v682_v8 = vpop.permute.xlu2 %681 }
 0x140   : > { %685 = vst.msk [vmem:[#allocation3 + $0xc] sm:$0xf] %vm649_vm2, %v682_v8 }
 0x147   : > { %v663_v9 = vpop.permute.xlu2 %662  ;;  %v712_v10 = vld [vmem:[#allocation3 + $0xc] sm:$0xf] }
 0x148   : > { %666 = vst.msk [vmem:[#allocation2 + $0xc] sm:$0xf] %vm649_vm2, %v663_v9  ;;  %v779_v11 = vsel %vm717_vm3, %v712_v10, 0 }
 0x149   : > { %788 = vmatpush.bf16.xpose.msrb.mxu0 %v779_v11 }
 0x14f   : > { %v708_v12 = vld [vmem:[#allocation2 + $0xc] sm:$0xf] }
 0x150   : > { %1833 = vmatmul.msk.bf16.vlgmr.msrb.gmra.mxu0 %vm717_vm3, %v708_v12 }
 0x157   : > { %v653_v13 = vpop.permute.xlu1 %652 }
 0x158   : > { %656 = vst.msk [vmem:[#allocation2 + $0x4] sm:$0xf] %vm649_vm2, %v653_v13  ;;  %v672_v14 = vpop.permute.xlu0 %671 }
 0x159   : > { %675 = vst.msk [vmem:[#allocation3 + $0x4] sm:$0xf] %vm649_vm2, %v672_v14 }
 0x15f   : > { %v658_v15 = vpop.permute.xlu1 %657  ;;  %v706_v20 = vld [vmem:[#allocation2 + $0x4] sm:$0xf] }
 0x160   : > { %661 = vst.msk [vmem:[#allocation2 + $0x8] sm:$0xf] %vm649_vm2, %v658_v15  ;;  %v677_v16 = vpop.permute.xlu0 %676  ;;  %v710_v17 = vld [vmem:[#allocation3 + $0x4] sm:$0xf] }
 0x161   : > { %680 = vst.msk [vmem:[#allocation3 + $0x8] sm:$0xf] %vm649_vm2, %v677_v16  ;;  %v741_v18 = vsel %vm717_vm3, %v710_v17, 0 }
 0x162   : > { %750 = vmatpush.bf16.xpose.msra.mxu2 %v741_v18 }
 0x167   : > { %v707_v23 = vld [vmem:[#allocation2 + $0x8] sm:$0xf] }
 0x168   : > { %v668_v19 = vpop.permute.xlu0 %667  ;;  %v711_v21 = vld [vmem:[#allocation3 + $0x8] sm:$0xf] }
 0x169   : > { %670 = vst.msk [vmem:[#allocation3] sm:$0xf] %vm649_vm2, %v668_v19  ;;  %1831 = vmatmul.msk.bf16.vlgmr.msra.gmra.mxu2 %vm717_vm3, %v706_v20  ;;  %v760_v22 = vsel %vm717_vm3, %v711_v21, 0 }
 0x16a   : > { %769 = vmatpush.bf16.xpose.msra.mxu3 %v760_v22 }
 0x170   : > { %v709_v24 = vld [vmem:[#allocation3] sm:$0xf] }
 0x171   : > { %1832 = vmatmul.msk.bf16.vlgmr.msra.gmra.mxu3 %vm717_vm3, %v707_v23  ;;  %v722_v25 = vsel %vm717_vm3, %v709_v24, 0 }
 0x172   : > { %731 = vmatpush.bf16.xpose.msra.mxu1 %v722_v25 }
 0x179   : > { %1830 = vmatmul.msk.bf16.vlgmr.msra.gmra.mxu1 %vm717_vm3, %v705_v26 }
 0x1cd   : > { %v790_v27 = vpop.f32.mrf.mxu0 }
 0x1ce   : > { %v797_v28 = vmul.f32 0.35355338, %v790_v27 }
 0x1d0   : > { %v807_v29 = vsel %vm717_vm3, %v797_v28, -inf }
 0x1d1   : > { %808 = vmax.xlane.f32.xlu0 %v807_v29  ;;  %v1915_v29 = vld [vmem:[%s2618_s17] sm:$0xff] }
 0x1d5   : > { %v792_v30 = vpop.f32.mrf.mxu0 }
 0x1d6   : > { %v2710_v30 = vld [vmem:[%s2582_s12] sm:$0xff]  ;;  %s2335_s12 = smov 24  }
 0x1e5   : > { %695 = vrot.lane.b32.xlu0 %v2646_v6, %s2329_s28 }
 0x1ec   : > { %v752_v31 = vpop.f32.mrf.mxu2 }
 0x1ed   : > { %v795_v32 = vmul.f32 0.35355338, %v752_v31  ;;  %686 = vrot.lane.b32.xlu0 %v2646_v6, %s2330_s4  ;;  %v1027_v31 = vpack.c.bf16 %v2710_v30, %v2710_v30 }
 0x1ef   : > { %v801_v33 = vsel %vm717_vm3, %v795_v32, -inf }
 0x1f0   : > { %802 = vmax.xlane.f32.xlu1 %v801_v33 }
 0x1f4   : > { %v754_v34 = vpop.f32.mrf.mxu2  ;;  %v771_v35 = vpop.f32.mrf.mxu3 }
 0x1f5   : > { %v796_v36 = vmul.f32 0.35355338, %v771_v35 }
 0x1f6   : > { %v733_v37 = vpop.f32.mrf.mxu1 }
 0x1f7   : > { %v804_v38 = vsel %vm717_vm3, %v796_v36, -inf  ;;  %v794_v39 = vmul.f32 0.35355338, %v733_v37 }
 0x1f8   : > { %805 = vmax.xlane.f32.xlu2 %v804_v38 }
 0x1f9   : > { %v798_v42 = vsel %vm717_vm3, %v794_v39, -inf }
 0x1fc   : > { %v773_v40 = vpop.f32.mrf.mxu3 }
 0x1fd   : > { %v1914_v40 = vld [vmem:[%s2613_s21 + $0x8] sm:$0xff] }
 0x1fe   : > { %v735_v41 = vpop.f32.mrf.mxu1 }
 0x1ff   : > { %v1913_v41 = vld [vmem:[%s2613_s21] sm:$0xff]  ;;  %s2960_s21 = scalar_lea.vmem [#allocation9], %s2590_s18 }
 0x200   : > { %799 = vmax.xlane.f32.xlu2 %v798_v42  ;;  %s2961_s29 = smov %s2960_s21 }
 0x209   : > { %690 = vrot.lane.b32.xlu1 %v2646_v6, %s2331_s8 }
 0x244   : > { %v809_v43 = vpop.xlane.xlu0 %808 }
 0x245   : > { %v813_v44 = vsub.f32 %v797_v28, %v809_v43  ;;  %v2705_v28 = vld [vmem:[%s2618_s17 + $0x8] sm:$0xff]  ;;  %s2334_s17 = smov 16  }
 0x247   : > { %v820_v45 = vmul.f32 1.442695, %v813_v44 }
 0x249   : > { %2056 = vpow2.f32 %v820_v45 }
 0x24f   : > { %v2057_v46 = vpop.eup %2056 }
 0x250   : > { %v831_v47 = vsel %vm717_vm3, %v2057_v46, 0.0 }
 0x251   : > { %832 = vadd.xlane.f32.xlu1 %v831_v47 }
 0x257   : > { %v696_v48 = vpop.permute.xlu0 %695 }
 0x258   : > { %699 = vst.msk [vmem:[#allocation4 + $0x8] sm:$0xf] %vm649_vm2, %v696_v48 }
 0x25f   : > { %v687_v49 = vpop.permute.xlu0 %686  ;;  %v715_v50 = vld [vmem:[#allocation4 + $0x8] sm:$0xf] }
 0x260   : > { %689 = vst.msk [vmem:[#allocation4] sm:$0xf] %vm649_vm2, %v687_v49  ;;  %v889_v51 = vsel %vm849_vm4, %v715_v50, 0  ;;  %v2731_v50 = vld [vmem:[%s2629_s27] sm:$0xff] }
 0x261   : > { %898 = vmatpush.bf16.msrb.mxu3 %v889_v51  ;;  %v948_v51 = vperm.slane %v2731_v50, 0 }
 0x263   : > { %v803_v52 = vpop.xlane.xlu1 %802 }
 0x264   : > { %v811_v53 = vsub.f32 %v795_v32, %v803_v52 }
 0x266   : > { %v816_v54 = vmul.f32 1.442695, %v811_v53 }
 0x267   : > { %v713_v55 = vld [vmem:[#allocation4] sm:$0xf] }
 0x268   : > { %2058 = vpow2.f32 %v816_v54  ;;  %v851_v56 = vsel %vm849_vm4, %v713_v55, 0 }
 0x269   : > { %860 = vmatpush.bf16.msrb.mxu1 %v851_v56 }
 0x26b   : > { %v806_v57 = vpop.xlane.xlu2 %805 }
 0x26c   : > { %v812_v58 = vsub.f32 %v796_v36, %v806_v57 }
 0x26d   : > { %970 = vmatpush.bf16.msra.mxu1 %v1914_v40 }
 0x26e   : > { %v2059_v59 = vpop.eup %2058  ;;  %v818_v60 = vmul.f32 1.442695, %v812_v58 }
 0x26f   : > { %v825_v61 = vsel %vm717_vm3, %v2059_v59, 0.0 }
 0x270   : > { %2060 = vpow2.f32 %v818_v60  ;;  %826 = vadd.xlane.f32.xlu2 %v825_v61 }
 0x271   : > { %971 = vmatpush.bf16.msra.mxu1 %v1913_v41 }
 0x273   : > { %v800_v62 = vpop.xlane.xlu2 %799 }
 0x274   : > { %v810_v63 = vsub.f32 %v794_v39, %v800_v62 }
 0x276   : > { %v2061_v0 = vpop.eup %2060  ;;  %v814_v1 = vmul.f32 1.442695, %v810_v63 }
 0x277   : > { %v828_v2 = vsel %vm717_vm3, %v2061_v0, 0.0 }
 0x278   : > { %2062 = vpow2.f32 %v814_v1  ;;  %829 = vadd.xlane.f32.xlu2 %v828_v2 }
 0x27b   : > { %v691_v4 = vpop.permute.xlu1 %690 }
 0x27c   : > { %694 = vst.msk [vmem:[#allocation4 + $0x4] sm:$0xf] %vm649_vm2, %v691_v4 }
 0x27e   : > { %v2063_v5 = vpop.eup %2062 }
 0x27f   : > { %v822_v7 = vsel %vm717_vm3, %v2063_v5, 0.0 }
 0x280   : > { %823 = vadd.xlane.f32.xlu0 %v822_v7 }
 0x283   : > { %v714_v8 = vld [vmem:[#allocation4 + $0x4] sm:$0xf] }
 0x284   : > { %v870_v9 = vsel %vm849_vm4, %v714_v8, 0 }
 0x285   : > { %879 = vmatpush.bf16.msrb.mxu2 %v870_v9 }
 0x289   : > { %1053 = vmatpush.bf16.msra.mxu2 %v2705_v28 }
 0x28d   : > { %1054 = vmatpush.bf16.msra.mxu2 %v1915_v29 }
 0x290   : > { %700 = vrot.lane.b32.xlu2 %v2646_v6, %s2332_s30 }
 0x294   : > { %1061 = vrot.lane.b32.xlu0 %v1915_v29, %s2330_s4 }
 0x2c4   : > { %v833_v15 = vpop.xlane.xlu1 %832 }
 0x2e3   : > { %v827_v10 = vpop.xlane.xlu2 %826 }
 0x2e4   : > { %2064 = vrcp.f32 %v827_v10 }
 0x2ea   : > { %v2065_v11 = vpop.eup %2064 }
 0x2eb   : > { %v839_v12 = vmul.f32 %v2065_v11, %v2059_v59  ;;  %v830_v13 = vpop.xlane.xlu2 %829 }
 0x2ec   : > { %2066 = vrcp.f32 %v830_v13 }
 0x2ed   : > { %v843_v14 = vpack.c.bf16 %v839_v12, %v839_v12  ;;  %2068 = vrcp.f32 %v833_v15 }
 0x2ef   : > { %1835 = vmatmul.msk.bf16.vlgmr.msrb.gmra.mxu2 %vm717_vm3, %v843_v14 }
 0x2f2   : > { %v2067_v16 = vpop.eup %2066 }
 0x2f3   : > { %v840_v17 = vmul.f32 %v2067_v16, %v2061_v0  ;;  %v701_v18 = vpop.permute.xlu2 %700  ;;  %v824_v19 = vpop.xlane.xlu0 %823 }
 0x2f4   : > { %704 = vst.msk [vmem:[#allocation4 + $0xc] sm:$0xf] %vm649_vm2, %v701_v18  ;;  %2070 = vrcp.f32 %v824_v19  ;;  %v2069_v20 = vpop.eup %2068 }
 0x2f5   : > { %v844_v6 = vpack.c.bf16 %v840_v17, %v840_v17  ;;  %v841_v22 = vmul.f32 %v2069_v20, %v2057_v46 }
 0x2f7   : > { %1836 = vmatmul.msk.bf16.vlgmr.msrb.gmra.mxu3 %vm717_vm3, %v844_v6  ;;  %v845_v27 = vpack.c.bf16 %v841_v22, %v841_v22 }
 0x2fa   : > { %v2071_v21 = vpop.eup %2070 }
 0x2fb   : > { %v838_v23 = vmul.f32 %v2071_v21, %v2063_v5  ;;  %v716_v24 = vld [vmem:[#allocation4 + $0xc] sm:$0xf] }
 0x2fc   : > { %v908_v25 = vsel %vm849_vm4, %v716_v24, 0 }
 0x2fd   : > { %917 = vmatpush.bf16.msra.mxu0 %v908_v25  ;;  %v842_v26 = vpack.c.bf16 %v838_v23, %v838_v23 }
 0x2ff   : > { %1834 = vmatmul.msk.bf16.vlgmr.msrb.gmra.mxu1 %vm717_vm3, %v842_v26  ;;  %1855 = vmatmul.msk.bf16.vlgmr.msra.gmra.mxu2 %vm631_vm1, %v1027_v31 }
 0x300   : > { %1837 = vmatmul.msk.bf16.vlgmr.msra.gmra.mxu0 %vm717_vm3, %v845_v27 }
 0x306   : > { %v1062_v52 = vpop.permute.xlu0 %1061 }
 0x372   : > { %v881_v32 = vpop.f32.mrf.mxu2 }
 0x373   : > { %925 = vrot.lane.b32.xlu2 %v881_v32, %s2333_s7 }
 0x37a   : > { %v883_v33 = vpop.f32.mrf.mxu2  ;;  %v900_v34 = vpop.f32.mrf.mxu3 }
 0x37b   : > { %931 = vrot.lane.b32.xlu2 %v900_v34, %s2334_s17 }
 0x37c   : > { %v862_v35 = vpop.f32.mrf.mxu1 }
 0x37d   : > { %923 = vst.msk [vmem:[#allocation5] sm:$0xff] %vm717_vm3, %v862_v35  ;;  %v919_v36 = vpop.f32.mrf.mxu0 }
 0x382   : > { %v902_v37 = vpop.f32.mrf.mxu3  ;;  %v1056_v47 = vpop.f32.mrf.mxu2 }
 0x383   : > { %937 = vrot.lane.b32.xlu2 %v919_v36, %s2335_s12  ;;  %v1083_v48 = vpack.c.bf16 %v1056_v47, %v1056_v47 }
 0x384   : > { %v864_v38 = vpop.f32.mrf.mxu1 }
 0x385   : > { %v921_v39 = vpop.f32.mrf.mxu0  ;;  %1084 = vst.msk [vmem:[#allocation2] sm:$0xf] %vm649_vm2, %v1083_v48  ;;  %1106 = vrot.lane.b32.xlu0 %v1083_v48, %s2327_s13 }
 0x38a   : > { %v1058_v49 = vpop.f32.mrf.mxu2 }
 0x38c   : > { %v1129_v21 = vld [vmem:[#allocation2] sm:$0xf] }
 0x38d   : > { %1090 = vrot.lane.b32.xlu0 %v1083_v48, %s2326_s22 }
 0x395   : > { %1086 = vrot.lane.b32.xlu0 %v1083_v48, %s2323_s1 }
 0x3cd   : > { %v926_v42 = vpop.permute.xlu2 %925 }
 0x3ce   : > { %929 = vst.msk [vmem:[#allocation5] sm:$0xff] %vm928_vm5, %v926_v42 }
 0x3d5   : > { %v932_v43 = vpop.permute.xlu2 %931 }
 0x3d6   : > { %935 = vst.msk [vmem:[#allocation5] sm:$0xff] %vm934_vm6, %v932_v43 }
 0x3dd   : > { %v938_v44 = vpop.permute.xlu2 %937 }
 0x3de   : > { %941 = vst.msk [vmem:[#allocation5] sm:$0xff] %vm940_vm7, %v938_v44 }
 0x3e5   : > { %v942_v45 = vld [vmem:[#allocation5] sm:$0xff] }
 0x3e6   : > { %v943_v46 = vpack.c.bf16 %v942_v45, %v942_v45 }
 0x3e8   : > { %1846 = vmatmul.msk.bf16.vlgmr.msra.gmra.mxu1 %vm631_vm1, %v943_v46 }
 0x3f7   : > { %v1107_v57 = vpop.permute.xlu0 %1106 }
 0x3f8   : > { %1109 = vst.msk [vmem:[#allocation3 + $0x8] sm:$0xf] %vm649_vm2, %v1107_v57 }
 0x3ff   : > { %v1091_v59 = vpop.permute.xlu0 %1090  ;;  %v1135_v60 = vld [vmem:[#allocation3 + $0x8] sm:$0xf] }
 0x400   : > { %1093 = vst.msk [vmem:[#allocation2 + $0x8] sm:$0xf] %vm649_vm2, %v1091_v59  ;;  %v1183_v61 = vsel %vm717_vm3, %v1135_v60, 0 }
 0x401   : > { %1192 = vmatpush.bf16.xpose.msrb.mxu2 %v1183_v61 }
 0x407   : > { %v1131_v62 = vld [vmem:[#allocation2 + $0x8] sm:$0xf]  ;;  %v1087_v22 = vpop.permute.xlu0 %1086 }
 0x408   : > { %1859 = vmatmul.msk.bf16.vlgmr.msrb.gmra.mxu2 %vm717_vm3, %v1131_v62  ;;  %1089 = vst.msk [vmem:[#allocation2 + $0x4] sm:$0xf] %vm649_vm2, %v1087_v22 }
 0x40f   : > { %v1130_v40 = vld [vmem:[#allocation2 + $0x4] sm:$0xf] }
 0x465   : > { %v973_v53 = vpop.f32.mrf.mxu1 }
 0x466   : > { %v974_v54 = vadd.f32 %v973_v53, %v948_v51  ;;  %v1022_v51 = vperm.slane %v2731_v50, 1 }
 0x468   : > { %v977_v55 = vadd.f32 %v974_v54, %v2641_v3  ;;  %v2336_v3 = vmov 32.0  }
 0x469   : > { %2072 = vrcp.f32 %v2336_v3 }
 0x46a   : > { %v978_v56 = vsel %vm631_vm1, %v977_v55, 0.0 }
 0x46b   : > { %979 = vadd.xlane.f32.xlu1 %v978_v56  ;;  %v1025_v56 = vperm.slane %v2731_v50, 2 }
 0x46d   : > { %v975_v58 = vpop.f32.mrf.mxu1 }
 0x46f   : > { %v2073_v63 = vpop.eup %2072 }
 0x470   : > { %v982_v0 = vmul.f32 32.0, %v2073_v63  ;;  %vm986_vm8 = vweird.f32 %v2073_v63 }
 0x472   : > { %v983_v1 = vsub.f32 1.0, %v982_v0 }
 0x474   : > { %v984_v2 = vmul.f32 %v2073_v63, %v983_v1 }
 0x476   : > { %v985_v4 = vadd.f32 %v2073_v63, %v984_v2 }
 0x478   : > { %v2745_v5 = vsel %vm986_vm8, %v2073_v63, %v985_v4 }
 0x484   : > { %1063 = vrot.lane.b32.xlu1 %v2705_v28, %s2330_s4 }
 0x48b   : > { %v1194_v14 = vpop.f32.mrf.mxu2 }
 0x48c   : > { %1110 = vrot.lane.b32.xlu1 %v1083_v48, %s2322_s0  ;;  %v2755_v15 = vmul.f32 0.35355338, %v1194_v14  ;;  %s2206_s0 = sshra.s32 %s1587_s20, 4  ;;  %s2207_s0 = int_to_ptr.hbm [resolvable:$true] %s2206_s0 }
 0x48d   : > { %p2213_p3 = scmp.lt.s32.totalorder %s2207_s0, %s2963_s26 }
 0x48e   : > { %v1227_v16 = vsel %vm717_vm3, %v2755_v15, -inf }
 0x48f   : > { %1228 = vmax.xlane.f32.xlu0 %v1227_v16 }
 0x493   : > { %v1196_v18 = vpop.f32.mrf.mxu2 }
 0x494   : > { %1094 = vrot.lane.b32.xlu1 %v1083_v48, %s2325_s19 }
 0x49c   : > { %1098 = vrot.lane.b32.xlu1 %v1083_v48, %s2328_s24 }
 0x4de   : > { %v980_v7 = vpop.xlane.xlu1 %979 }
 0x4df   : > { %v988_v8 = vmul.f32 %v2745_v5, %v980_v7 }
 0x4e1   : > { %v2748_v9 = vsub.f32 %v977_v55, %v988_v8 }
 0x4e3   : > { %v990_v10 = vmul.f32 %v2748_v9, %v2748_v9 }
 0x4e5   : > { %v991_v11 = vsel %vm631_vm1, %v990_v10, 0.0 }
 0x4e6   : > { %992 = vadd.xlane.f32.xlu2 %v991_v11 }
 0x4f6   : > { %v1064_v12 = vpop.permute.xlu1 %1063 }
 0x4f7   : > { %1076 = vmatpush.bf16.msra.mxu3 %v1064_v12 }
 0x4fb   : > { %1077 = vmatpush.bf16.msra.mxu3 %v1062_v52 }
 0x4fe   : > { %v1111_v13 = vpop.permute.xlu1 %1110  ;;  %1102 = vrot.lane.b32.xlu2 %v1083_v48, %s2324_s14 }
 0x4ff   : > { %1113 = vst.msk [vmem:[#allocation3 + $0xc] sm:$0xf] %vm649_vm2, %v1111_v13 }
 0x502   : > { %v1229_v60 = vpop.xlane.xlu0 %1228 }
 0x503   : > { %v1235_v61 = vsub.f32 %v2755_v15, %v1229_v60 }
 0x505   : > { %v1241_v62 = vmul.f32 1.442695, %v1235_v61 }
 0x506   : > { %v1095_v17 = vpop.permute.xlu1 %1094  ;;  %v1136_v35 = vld [vmem:[#allocation3 + $0xc] sm:$0xf] }
 0x507   : > { %1097 = vst.msk [vmem:[#allocation2 + $0xc] sm:$0xf] %vm649_vm2, %v1095_v17  ;;  %v1202_v36 = vsel %vm717_vm3, %v1136_v35, 0 }
 0x508   : > { %1211 = vmatpush.bf16.xpose.msrb.mxu3 %v1202_v36 }
 0x50e   : > { %v1099_v19 = vpop.permute.xlu1 %1098  ;;  %v1132_v3 = vld [vmem:[#allocation2 + $0xc] sm:$0xf] }
 0x50f   : > { %1101 = vst.msk [vmem:[#allocation3] sm:$0xf] %vm649_vm2, %v1099_v19 }
 0x516   : > { %v1133_v6 = vld [vmem:[#allocation3] sm:$0xf] }
 0x517   : > { %v1145_v20 = vsel %vm717_vm3, %v1133_v6, 0 }
 0x518   : > { %1154 = vmatpush.bf16.xpose.msrb.mxu0 %v1145_v20 }
 0x51f   : > { %1857 = vmatmul.msk.bf16.vlgmr.msrb.gmra.mxu0 %vm717_vm3, %v1129_v21 }
 0x559   : > { %v993_v23 = vpop.xlane.xlu2 %992 }
 0x55a   : > { %v994_v24 = vmul.f32 0.032258064, %v993_v23 }
 0x55c   : > { %2074 = vrsqrt.f32 %v994_v24  ;;  %vm1002_vm9 = vcmp.eq.f32.partialorder %v994_v24, inf  ;;  %v1005_v38 = vand.u32 2147483648, %v994_v24  ;;  %vm1004_vm10 = vcmp.eq.f32.partialorder %v994_v24, 0.0 }
 0x561   : > { %v1103_v25 = vpop.permute.xlu2 %1102 }
 0x562   : > { %v2075_v26 = vpop.eup %2074  ;;  %1105 = vst.msk [vmem:[#allocation3 + $0x4] sm:$0xf] %vm649_vm2, %v1103_v25 }
 0x563   : > { %v996_v27 = vmul.f32 %v2075_v26, %v994_v24 }
 0x565   : > { %v997_v28 = vmul.f32 %v2075_v26, %v996_v27 }
 0x567   : > { %v998_v29 = vmul.f32 0.5, %v997_v28 }
 0x569   : > { %v999_v31 = vsub.f32 1.5, %v998_v29  ;;  %v1134_v32 = vld [vmem:[#allocation3 + $0x4] sm:$0xf] }
 0x56a   : > { %v1164_v33 = vsel %vm717_vm3, %v1134_v32, 0 }
 0x56b   : > { %v1000_v34 = vmul.f32 %v2075_v26, %v999_v31  ;;  %1173 = vmatpush.bf16.xpose.msrb.mxu1 %v1164_v33 }
 0x56d   : > { %v1001_v37 = vmul.f32 %v1000_v34, %v994_v24 }
 0x56f   : > { %v1003_v39 = vsel %vm1002_vm9, %v994_v24, %v1001_v37 }
 0x570   : > { %v1006_v41 = vsel %vm1004_vm10, %v1005_v38, %v1003_v39 }
 0x571   : > { %v1007_v42 = vadd.f32 1e-06, %v1006_v41 }
 0x572   : > { %1858 = vmatmul.msk.bf16.vlgmr.msrb.gmra.mxu1 %vm717_vm3, %v1130_v40 }
 0x573   : > { %2076 = vrcp.f32 %v1007_v42  ;;  %v1019_v46 = vand.u32 2147483648, %v1007_v42  ;;  %v1017_v48 = vand.u32 2147483647, %v1007_v42  ;;  %vm1013_vm12 = vweird.f32 %v1007_v42 }
 0x574   : > { %2078 = vpow2.f32 %v1241_v62 }
 0x575   : > { %v1020_v52 = vor.u32 1.1754944e-38, %v1019_v46  ;;  %vm1018_vm14 = vcmp.eq.f32.partialorder %v1017_v48, 8.507059e+37 }
 0x579   : > { %v2077_v43 = vpop.eup %2076 }
 0x57a   : > { %v1009_v44 = vmul.f32 %v2077_v43, %v1007_v42  ;;  %vm1014_vm11 = vweird.f32 %v2077_v43  ;;  %v2079_v2 = vpop.eup %2078 }
 0x57b   : > { %vm1015_vm13 = vmor %vm1013_vm12, %vm1014_vm11  ;;  %v1251_v7 = vsel %vm717_vm3, %v2079_v2, 0.0 }
 0x57c   : > { %v1010_v45 = vsub.f32 1.0, %v1009_v44 }
 0x57e   : > { %v1011_v47 = vmul.f32 %v2077_v43, %v1010_v45 }
 0x580   : > { %v1012_v49 = vadd.f32 %v2077_v43, %v1011_v47 }
 0x582   : > { %v1016_v53 = vsel %vm1015_vm13, %v2077_v43, %v1012_v49 }
 0x583   : > { %v1021_v54 = vsel %vm1018_vm14, %v1020_v52, %v1016_v53 }
 0x584   : > { %v1023_v55 = vmul.f32 %v1022_v51, %v1021_v54 }
 0x586   : > { %v1024_v57 = vmul.f32 %v1023_v55, %v2748_v9 }
 0x588   : > { %v1026_v58 = vadd.f32 %v1025_v56, %v1024_v57 }
 0x58a   : > { %v1060_v59 = vpack.c.bf16 %v1026_v58, %v1026_v58 }
 0x58c   : > { %1856 = vmatmul.msk.bf16.vlgmr.msra.gmra.mxu3 %vm631_vm1, %v1060_v59 }
 0x59c   : > { %v1156_v63 = vpop.f32.mrf.mxu0  ;;  %1860 = vmatmul.msk.bf16.vlgmr.msrb.gmra.mxu3 %vm717_vm3, %v1132_v3 }
 0x59d   : > { %v1217_v0 = vmul.f32 0.35355338, %v1156_v63 }
 0x59f   : > { %v1221_v1 = vsel %vm717_vm3, %v1217_v0, -inf }
 0x5a0   : > { %1222 = vmax.xlane.f32.xlu0 %v1221_v1 }
 0x5a4   : > { %v1158_v4 = vpop.f32.mrf.mxu0 }
 0x5a8   : > { %1252 = vadd.xlane.f32.xlu0 %v1251_v7 }
 0x5ef   : > { %v1175_v8 = vpop.f32.mrf.mxu1 }
 0x5f0   : > { %v1218_v9 = vmul.f32 0.35355338, %v1175_v8  ;;  %v1918_v8 = vld [vmem:[%s2960_s21 + $0x8] sm:$0xff] }
 0x5f2   : > { %v1224_v10 = vsel %vm717_vm3, %v1218_v9, -inf }
 0x5f3   : > { %1225 = vmax.xlane.f32.xlu2 %v1224_v10 }
 0x5f7   : > { %v1177_v11 = vpop.f32.mrf.mxu1 }
 0x60f   : > { %v1079_v12 = vpop.f32.mrf.mxu3 }
 0x610   : > { %v1114_v13 = vpack.c.bf16 %v1079_v12, %v1079_v12 }
 0x612   : > { %1115 = vst.msk [vmem:[#allocation4] sm:$0xf] %vm649_vm2, %v1114_v13  ;;  %1125 = vrot.lane.b32.xlu2 %v1114_v13, %s2325_s19 }
 0x613   : > { %v1223_v6 = vpop.xlane.xlu0 %1222 }
 0x614   : > { %v1233_v21 = vsub.f32 %v1217_v0, %v1223_v6 }
 0x616   : > { %v1237_v22 = vmul.f32 1.442695, %v1233_v21 }
 0x617   : > { %v1081_v14 = vpop.f32.mrf.mxu3 }
 0x618   : > { %2080 = vpow2.f32 %v1237_v22 }
 0x619   : > { %v1137_v15 = vld [vmem:[#allocation4] sm:$0xf] }
 0x61a   : > { %v1273_v16 = vsel %vm849_vm4, %v1137_v15, 0  ;;  %v1367_v15 = vperm.slane %v2731_v50, 3 }
 0x61b   : > { %1282 = vmatpush.bf16.msra.mxu0 %v1273_v16  ;;  %v1253_v39 = vpop.xlane.xlu0 %1252 }
 0x61e   : > { %v2081_v23 = vpop.eup %2080 }
 0x61f   : > { %v1213_v17 = vpop.f32.mrf.mxu3  ;;  %v1245_v24 = vsel %vm717_vm3, %v2081_v23, 0.0  ;;  %1389 = vmatpush.bf16.msrb.mxu0 %v1918_v8 }
 0x620   : > { %v1220_v18 = vmul.f32 0.35355338, %v1213_v17 }
 0x622   : > { %v1230_v19 = vsel %vm717_vm3, %v1220_v18, -inf }
 0x623   : > { %1231 = vmax.xlane.f32.xlu1 %v1230_v19 }
 0x627   : > { %v1215_v20 = vpop.f32.mrf.mxu3 }
 0x63b   : > { %1246 = vadd.xlane.f32.xlu2 %v1245_v24 }
 0x63c   : > { %1121 = vrot.lane.b32.xlu1 %v1114_v13, %s2326_s22 }
 0x666   : > { %v1226_v25 = vpop.xlane.xlu2 %1225 }
 0x667   : > { %v1234_v26 = vsub.f32 %v1218_v9, %v1226_v25  ;;  %v1917_v9 = vld [vmem:[%s2961_s29] sm:$0xff] }
 0x668   : > { %1390 = vmatpush.bf16.msrb.mxu0 %v1917_v9  ;;  %v1920_v25 = vld [vmem:[%s489_s16 + $0x8] sm:$0xff] }
 0x669   : > { %v1239_v27 = vmul.f32 1.442695, %v1234_v26  ;;  %v1919_v26 = vld [vmem:[%s489_s16] sm:$0xff] }
 0x66b   : > { %2082 = vpow2.f32 %v1239_v27 }
 0x66e   : > { %v1126_v28 = vpop.permute.xlu2 %1125 }
 0x66f   : > { %1128 = vst.msk [vmem:[#allocation4 + $0xc] sm:$0xf] %vm649_vm2, %v1126_v28 }
 0x671   : > { %v2083_v29 = vpop.eup %2082 }
 0x672   : > { %v1248_v31 = vsel %vm717_vm3, %v2083_v29, 0.0 }
 0x673   : > { %1249 = vadd.xlane.f32.xlu1 %v1248_v31 }
 0x676   : > { %v1140_v32 = vld [vmem:[#allocation4 + $0xc] sm:$0xf] }
 0x677   : > { %v1330_v33 = vsel %vm849_vm4, %v1140_v32, 0 }
 0x678   : > { %1339 = vmatpush.bf16.msra.mxu3 %v1330_v33 }
 0x696   : > { %v1232_v34 = vpop.xlane.xlu1 %1231 }
 0x697   : > { %v1236_v35 = vsub.f32 %v1220_v18, %v1232_v34 }
 0x699   : > { %v1243_v36 = vmul.f32 1.442695, %v1236_v35  ;;  %v1924_v35 = vld [vmem:[%s2624_s10 + $0x18] sm:$0xff] }
 0x69b   : > { %2084 = vpow2.f32 %v1243_v36 }
 0x69c   : > { %2086 = vrcp.f32 %v1253_v39 }
 0x6a1   : > { %v2085_v37 = vpop.eup %2084 }
 0x6a2   : > { %v1254_v38 = vsel %vm717_vm3, %v2085_v37, 0.0  ;;  %v2087_v42 = vpop.eup %2086 }
 0x6a3   : > { %1255 = vadd.xlane.f32.xlu0 %v1254_v38  ;;  %v1263_v44 = vmul.f32 %v2087_v42, %v2079_v2  ;;  %v1923_v38 = vld [vmem:[%s2624_s10 + $0x10] sm:$0xff] }
 0x6a5   : > { %v1267_v49 = vpack.c.bf16 %v1263_v44, %v1263_v44 }
 0x6ae   : > { %v1122_v40 = vpop.permute.xlu1 %1121  ;;  %v1247_v41 = vpop.xlane.xlu2 %1246 }
 0x6af   : > { %1124 = vst.msk [vmem:[#allocation4 + $0x8] sm:$0xf] %vm649_vm2, %v1122_v40  ;;  %2088 = vrcp.f32 %v1247_v41 }
 0x6b5   : > { %v2089_v43 = vpop.eup %2088 }
 0x6b6   : > { %v1261_v45 = vmul.f32 %v2089_v43, %v2081_v23  ;;  %v1139_v46 = vld [vmem:[#allocation4 + $0x8] sm:$0xf] }
 0x6b7   : > { %1117 = vrot.lane.b32.xlu0 %v1114_v13, %s2323_s1  ;;  %v1311_v47 = vsel %vm849_vm4, %v1139_v46, 0  ;;  %s2208_s1 = scalar_lea.hbm %s2207_s0, 8 }
 0x6b8   : > { %v1265_v48 = vpack.c.bf16 %v1261_v45, %v1261_v45  ;;  %1320 = vmatpush.bf16.msra.mxu2 %v1311_v47  ;;  %p2209_p10 = scmp.ne.s32.totalorder %s2207_s0, %s2208_s1 }
 0x6ba   : > { %1861 = vmatmul.msk.bf16.vlgmr.msra.gmra.mxu0 %vm717_vm3, %v1265_v48  ;;  %p2210_p12 = pnand %p2209_p10, %p2543_p11 }
 0x6bb   : > { %1863 = vmatmul.msk.bf16.vlgmr.msra.gmra.mxu2 %vm717_vm3, %v1267_v49  ;;  %v1434_v49 = vperm.slane %v2731_v50, 4 }
 0x6bc   : > { %1518 = vmatpush.bf16.msrb.mxu2 %v1924_v35  ;;  %p2211_p13 = pneg %p2210_p12 }
 0x6c0   : > { %1519 = vmatpush.bf16.msrb.mxu2 %v1923_v38 }
 0x6e6   : > { %v1250_v55 = vpop.xlane.xlu1 %1249 }
 0x716   : > { %v1256_v51 = vpop.xlane.xlu0 %1255 }
 0x717   : > { %2090 = vrcp.f32 %v1256_v51 }
 0x718   : > { %2092 = vrcp.f32 %v1250_v55  ;;  %v1437_v55 = vperm.slane %v2731_v50, 5 }
 0x71d   : > { %v2091_v52 = vpop.eup %2090 }
 0x71e   : > { %v1264_v53 = vmul.f32 %v2091_v52, %v2085_v37  ;;  %v2093_v57 = vpop.eup %2092 }
 0x71f   : > { %v1262_v58 = vmul.f32 %v2093_v57, %v2083_v29 }
 0x720   : > { %v1268_v54 = vpack.c.bf16 %v1264_v53, %v1264_v53 }
 0x721   : > { %v1266_v61 = vpack.c.bf16 %v1262_v58, %v1262_v58 }
 0x722   : > { %1864 = vmatmul.msk.bf16.vlgmr.msra.gmra.mxu3 %vm717_vm3, %v1268_v54 }
 0x729   : > { %v1118_v56 = vpop.permute.xlu0 %1117 }
 0x72a   : > { %1120 = vst.msk [vmem:[#allocation4 + $0x4] sm:$0xf] %vm649_vm2, %v1118_v56 }
 0x731   : > { %v1138_v59 = vld [vmem:[#allocation4 + $0x4] sm:$0xf] }
 0x732   : > { %v1292_v60 = vsel %vm849_vm4, %v1138_v59, 0  ;;  %v1922_v59 = vld [vmem:[%s2624_s10 + $0x8] sm:$0xff] }
 0x733   : > { %1301 = vmatpush.bf16.msra.mxu1 %v1292_v60  ;;  %1520 = vmatpush.bf16.msrb.mxu2 %v1922_v59  ;;  %v1921_v60 = vld [vmem:[%s2624_s10] sm:$0xff] }
 0x736   : > { %1862 = vmatmul.msk.bf16.vlgmr.msra.gmra.mxu1 %vm717_vm3, %v1266_v61  ;;  %v2054_v61 = vld [vmem:[%s600_s15] ss:$0 sm:$0xff]  ;;  %s1572_s15 = scalar_lea.sflag [#allocation8], %s2578_s6 }
 0x737   : > { %v1284_v62 = vpop.f32.mrf.mxu0  ;;  %1468 = vmatpush.bf16.msrb.mxu1 %v1920_v25  ;;  %1521 = vmatpush.bf16.msrb.mxu2 %v1921_v60 }
 0x738   : > { %1345 = vst.msk [vmem:[#allocation5] sm:$0xff] %vm717_vm3, %v1284_v62 }
 0x73b   : > { %1469 = vmatpush.bf16.msrb.mxu1 %v1919_v26 }
 0x73e   : > { %v1322_v3 = vpop.f32.mrf.mxu2 }
 0x73f   : > { %v1286_v63 = vpop.f32.mrf.mxu0 }
 0x746   : > { %v1324_v0 = vpop.f32.mrf.mxu2 }
 0x7a5   : > { %v1341_v1 = vpop.f32.mrf.mxu3 }
 0x7ad   : > { %v1343_v2 = vpop.f32.mrf.mxu3 }
 0x7ae   : > { %v1485_v2 = vperm.slane %v2731_v50, 6 }
 0x7b3   : > { %v1303_v4 = vpop.f32.mrf.mxu1 }
 0x7b4   : > { %1347 = vrot.lane.b32.xlu0 %v1303_v4, %s2333_s7 }
 0x7bb   : > { %v1305_v7 = vpop.f32.mrf.mxu1 }
 0x7bc   : > { %1352 = vrot.lane.b32.xlu0 %v1322_v3, %s2334_s17 }
 0x7c4   : > { %1357 = vrot.lane.b32.xlu0 %v1341_v1, %s2335_s12 }
 0x826   : > { %v1348_v10 = vpop.permute.xlu0 %1347 }
 0x827   : > { %1350 = vst.msk [vmem:[#allocation5] sm:$0xff] %vm928_vm5, %v1348_v10 }
 0x82e   : > { %v1353_v11 = vpop.permute.xlu0 %1352 }
 0x82f   : > { %1355 = vst.msk [vmem:[#allocation5] sm:$0xff] %vm934_vm6, %v1353_v11  ;;  %vm1510_vm6 = vcmask 523264  }
 0x836   : > { %v1358_v12 = vpop.permute.xlu0 %1357 }
 0x837   : > { %1360 = vst.msk [vmem:[#allocation5] sm:$0xff] %vm940_vm7, %v1358_v12 }
 0x83e   : > { %v1361_v13 = vld [vmem:[#allocation5] sm:$0xff] }
 0x83f   : > { %v1362_v14 = vpack.c.bf16 %v1361_v13, %v1361_v13 }
 0x841   : > { %1873 = vmatmul.msk.bf16.vlgmr.msrb.gmra.mxu0 %vm631_vm1, %v1362_v14 }
 0x8be   : > { %v1392_v16 = vpop.f32.mrf.mxu0 }
 0x8bf   : > { %v1393_v17 = vadd.f32 %v1392_v16, %v1367_v15 }
 0x8c1   : > { %v1396_v18 = vadd.f32 %v1393_v17, %v2710_v30 }
 0x8c3   : > { %v1397_v19 = vsel %vm631_vm1, %v1396_v18, 0.0 }
 0x8c4   : > { %1398 = vadd.xlane.f32.xlu0 %v1397_v19 }
 0x8c6   : > { %v1394_v6 = vpop.f32.mrf.mxu0 }
 0x937   : > { %v1399_v20 = vpop.xlane.xlu0 %1398 }
 0x938   : > { %v1400_v21 = vmul.f32 %v1399_v20, %v2745_v5 }
 0x93a   : > { %v1401_v22 = vsub.f32 %v1396_v18, %v1400_v21 }
 0x93c   : > { %v1402_v23 = vmul.f32 %v1401_v22, %v1401_v22 }
 0x93e   : > { %v1403_v24 = vsel %vm631_vm1, %v1402_v23, 0.0 }
 0x93f   : > { %1404 = vadd.xlane.f32.xlu1 %v1403_v24 }
 0x9b2   : > { %v1405_v30 = vpop.xlane.xlu1 %1404 }
 0x9b3   : > { %v1406_v27 = vmul.f32 0.032258064, %v1405_v30 }
 0x9b5   : > { %2094 = vrsqrt.f32 %v1406_v27  ;;  %vm1414_vm15 = vcmp.eq.f32.partialorder %v1406_v27, inf  ;;  %v1417_v37 = vand.u32 2147483648, %v1406_v27  ;;  %vm1416_vm0 = vcmp.eq.f32.partialorder %v1406_v27, 0.0 }
 0x9bb   : > { %v2095_v28 = vpop.eup %2094 }
 0x9bc   : > { %v1408_v29 = vmul.f32 %v2095_v28, %v1406_v27 }
 0x9be   : > { %v1409_v31 = vmul.f32 %v2095_v28, %v1408_v29 }
 0x9c0   : > { %v1410_v32 = vmul.f32 0.5, %v1409_v31 }
 0x9c2   : > { %v1411_v33 = vsub.f32 1.5, %v1410_v32 }
 0x9c4   : > { %v1412_v34 = vmul.f32 %v2095_v28, %v1411_v33 }
 0x9c6   : > { %v1413_v36 = vmul.f32 %v1412_v34, %v1406_v27  ;;  %v1565_v34 = vperm.slane %v2731_v50, 7 }
 0x9c8   : > { %v1415_v39 = vsel %vm1414_vm15, %v1406_v27, %v1413_v36 }
 0x9c9   : > { %v1418_v40 = vsel %vm1416_vm0, %v1417_v37, %v1415_v39  ;;  %v2055_v39 = vld [vmem:[%s2629_s27 + $0x8] ss:$0 sm:$0xff]  ;;  %s2212_s27 = scalar_lea.hbm %s2963_s26, 16 }
 0x9ca   : > { %v1419_v41 = vadd.f32 1e-06, %v1418_v40  ;;  %p2214_p1 = scmp.lt.s32.totalorder %s2212_s27, %s2208_s1 }
 0x9cc   : > { %2096 = vrcp.f32 %v1419_v41  ;;  %v1431_v45 = vand.u32 2147483648, %v1419_v41  ;;  %v1429_v47 = vand.u32 2147483647, %v1419_v41  ;;  %vm1425_vm3 = vweird.f32 %v1419_v41  ;;  %p2215_p8 = por %p2214_p1, %p2213_p3 }
 0x9ce   : > { %v1432_v51 = vor.u32 1.1754944e-38, %v1431_v45  ;;  %vm1430_vm5 = vcmp.eq.f32.partialorder %v1429_v47, 8.507059e+37  ;;  %p2216_p9 = pnand %p2215_p8, %p2211_p13 }
 0x9d2   : > { %v2097_v42 = vpop.eup %2096 }
 0x9d3   : > { %v1421_v43 = vmul.f32 %v2097_v42, %v1419_v41  ;;  %vm1426_vm2 = vweird.f32 %v2097_v42 }
 0x9d4   : > { %vm1427_vm4 = vmor %vm1425_vm3, %vm1426_vm2 }
 0x9d5   : > { %v1422_v44 = vsub.f32 1.0, %v1421_v43 }
 0x9d7   : > { %v1423_v46 = vmul.f32 %v2097_v42, %v1422_v44 }
 0x9d9   : > { %v1424_v48 = vadd.f32 %v2097_v42, %v1423_v46 }
 0x9db   : > { %v1428_v52 = vsel %vm1427_vm4, %v2097_v42, %v1424_v48 }
 0x9dc   : > { %v1433_v53 = vsel %vm1430_vm5, %v1432_v51, %v1428_v52 }
 0x9dd   : > { %v1435_v54 = vmul.f32 %v1434_v49, %v1433_v53 }
 0x9df   : > { %v1436_v56 = vmul.f32 %v1435_v54, %v1401_v22 }
 0x9e1   : > { %v1438_v57 = vadd.f32 %v1437_v55, %v1436_v56 }
 0x9e3   : > { %v1439_v58 = vpack.c.bf16 %v1438_v57, %v1438_v57 }
 0x9e5   : > { %1882 = vmatmul.msk.bf16.vlgmr.msrb.gmra.mxu1 %vm631_vm1, %v1439_v58 }
 0xa62   : > { %v1471_v62 = vpop.f32.mrf.mxu1 }
 0xa63   : > { %v1472_v3 = vadd.f32 %v2054_v61, %v1471_v62 }
 0xa65   : > { %v1475_v63 = vmax.f32 %v1472_v3, 0.0 }
 0xa67   : > { %v1476_v0 = vpack.c.bf16 %v1475_v63, %v1475_v63 }
 0xa69   : > { %1899 = vmatmul.msk.bf16.vlgmr.msrb.gmra.mxu2 %vm1510_vm6, %v1476_v0 }
 0xa6a   : > { %v1473_v1 = vpop.f32.mrf.mxu1 }
 0xaec   : > { %v1523_v4 = vpop.f32.mrf.mxu2 }
 0xaed   : > { %v1524_v7 = vadd.f32 %v1523_v4, %v1485_v2 }
 0xaef   : > { %v1527_v8 = vadd.f32 %v1524_v7, %v1438_v57 }
 0xaf1   : > { %v1528_v9 = vsel %vm631_vm1, %v1527_v8, 0.0 }
 0xaf2   : > { %1529 = vadd.xlane.f32.xlu1 %v1528_v9 }
 0xaf4   : > { %v1525_v10 = vpop.f32.mrf.mxu2 }
 0xb65   : > { %v1530_v11 = vpop.xlane.xlu1 %1529 }
 0xb66   : > { %v1531_v12 = vmul.f32 %v1530_v11, %v2745_v5 }
 0xb68   : > { %v1532_v13 = vsub.f32 %v1527_v8, %v1531_v12 }
 0xb6a   : > { %v1533_v14 = vmul.f32 %v1532_v13, %v1532_v13 }
 0xb6c   : > { %v1534_v15 = vsel %vm631_vm1, %v1533_v14, 0.0 }
 0xb6d   : > { %1535 = vadd.xlane.f32.xlu2 %v1534_v15 }
 0xbe0   : > { %v1536_v16 = vpop.xlane.xlu2 %1535 }
 0xbe1   : > { %v1537_v17 = vmul.f32 0.032258064, %v1536_v16 }
 0xbe3   : > { %2098 = vrsqrt.f32 %v1537_v17  ;;  %vm1545_vm7 = vcmp.eq.f32.partialorder %v1537_v17, inf  ;;  %v1548_v24 = vand.u32 2147483648, %v1537_v17  ;;  %vm1547_vm8 = vcmp.eq.f32.partialorder %v1537_v17, 0.0 }
 0xbe9   : > { %v2099_v18 = vpop.eup %2098 }
 0xbea   : > { %v1539_v19 = vmul.f32 %v2099_v18, %v1537_v17 }
 0xbec   : > { %v1540_v6 = vmul.f32 %v2099_v18, %v1539_v19 }
 0xbee   : > { %v1541_v20 = vmul.f32 0.5, %v1540_v6 }
 0xbf0   : > { %v1542_v21 = vsub.f32 1.5, %v1541_v20 }
 0xbf2   : > { %v1543_v22 = vmul.f32 %v2099_v18, %v1542_v21 }
 0xbf4   : > { %v1544_v23 = vmul.f32 %v1543_v22, %v1537_v17 }
 0xbf6   : > { %v1546_v25 = vsel %vm1545_vm7, %v1537_v17, %v1544_v23 }
 0xbf7   : > { %v1549_v5 = vsel %vm1547_vm8, %v1548_v24, %v1546_v25 }
 0xbf8   : > { %v1550_v26 = vadd.f32 1e-06, %v1549_v5 }
 0xbfa   : > { %2100 = vrcp.f32 %v1550_v26  ;;  %v1562_v29 = vand.u32 2147483648, %v1550_v26  ;;  %v1560_v32 = vand.u32 2147483647, %v1550_v26  ;;  %vm1556_vm10 = vweird.f32 %v1550_v26 }
 0xbfc   : > { %v1563_v35 = vor.u32 1.1754944e-38, %v1562_v29  ;;  %vm1561_vm12 = vcmp.eq.f32.partialorder %v1560_v32, 8.507059e+37 }
 0xc00   : > { %v2101_v30 = vpop.eup %2100 }
 0xc01   : > { %v1552_v27 = vmul.f32 %v2101_v30, %v1550_v26  ;;  %vm1557_vm9 = vweird.f32 %v2101_v30 }
 0xc02   : > { %vm1558_vm11 = vmor %vm1556_vm10, %vm1557_vm9 }
 0xc03   : > { %v1553_v28 = vsub.f32 1.0, %v1552_v27 }
 0xc05   : > { %v1554_v31 = vmul.f32 %v2101_v30, %v1553_v28 }
 0xc07   : > { %v1555_v33 = vadd.f32 %v2101_v30, %v1554_v31 }
 0xc09   : > { %v1559_v36 = vsel %vm1558_vm11, %v2101_v30, %v1555_v33 }
 0xc0a   : > { %v1564_v37 = vsel %vm1561_vm12, %v1563_v35, %v1559_v36 }
 0xc0b   : > { %v1566_v38 = vmul.f32 %v1565_v34, %v1564_v37 }
 0xc0d   : > { %v1567_v40 = vmul.f32 %v1566_v38, %v1532_v13 }
 0xc0f   : > { %v1569_v41 = vadd.f32 %v2055_v39, %v1567_v40 }
 0xc11   : > { %1570 = vst.msk [vmem:[%s2636_s23] sm:$0xff] %vm631_vm1, %v1569_v41 }
 0xc12   : > { %2219 = shalt.err (!%p2216_p9)
}
 0xc13   : > { %1931 = dma.vmem_to_hbm [thread:$0]  (%p2543_p11), %s1585_s5, 128, %s1587_s20, %s1572_s15  }
 0xc14 PF: > { %s2964_s23 = sld [smem:[#allocation23_spill]] }
 0xc15   : > { %s2965_s6 = sld [smem:[#allocation18_spill]] }
 0xc1a   : > { %p1948_p7 = scmp.ge.s32.totalorder %s2964_s23, 2 }
 0xc1b   : > { %s1598_s28 = sand.u32 1, %s2965_s6  }
 0xc1c   : > { %p1944_p5 = pnand %p1948_p7, %p2556_p2  ;;  %s1599_s4 = scalar_lea.sflag [#allocation8], %s1598_s28 }
 0xc1e   : > { %p1945_p0 = pneg %p1944_p5 }
 0xc20   : > { %2273 = dma.done.wait (%p1945_p0), %s1599_s4, 128  }
 0xc21   : > { %2275 = vsyncadd (%p1945_p0), %s1599_s4, 4294967168  ;;  %s29_s23 = sadd.s32 1, %s2964_s23   ;;  %s2967_s13 = sld [smem:[#allocation16_spill]] }
 0xc22   : > { %p26_p4 = scmp.ge.s32.totalorder %s29_s23, 6   ;;  %s2968_s14 = sld [smem:[#allocation17_spill]] }
 0xc23   : > { %s2969_s15 = sld [smem:[#allocation25_spill]] }
 0xc24   : > { %s2970_s16 = sld [smem:[#allocation19_spill]] }
 0xc25   : > { %s2971_s17 = sld [smem:[#allocation20_spill]] }
 0xc26   : > { %s2972_s18 = sld [smem:[#allocation27_spill]]  ;;  %28 = sbr.rel (!%p26_p4) target bundleno = 23 (0x17), region = 163 }
 0xc27   : > { %s2973_s19 = sld [smem:[#allocation21_spill]] }
 0xc28   : > { %s2974_s20 = sld [smem:[#allocation22_spill]] }
 0xc29   : > { %s2975_s21 = sld [smem:[#allocation24_spill]] }
 0xc2a   : > { %s2976_s22 = sld [smem:[#allocation26_spill]] }
 0xc2b   :  { %1605 = vsyncpa [#allocation7], 1 }
 0xc2c   :  { %1607 = vsyncpa [#allocation7 + $0x1], 1 }
 0xc2d   :  { %1608 = vsyncpa [#allocation10], 1 }
 0xc2e   :  { %1610 = vsyncpa [#allocation10 + $0x1], 1 }
 0xc2f   :  { %1611 = vsyncpa [#allocation8], 1 }
 0xc30   :  { %1613 = vsyncpa [#allocation8 + $0x1], 1 }

</bundles_post_ra>
